<compile_context>
chip_gen: v5e
topology: v5e:2x2
jax: 0.10.0
libtpu: 0.0.40
codegen_flags: <defaults>
</compile_context>

<pallas_src>
import jax
import jax.numpy as jnp
from jax.experimental import pallas as pl
from jax.experimental.pallas import tpu as pltpu


HP = 128            # padded hidden width (lane-dense, one full vreg width)
OP = 128            # padded FC output width (lane-dense store)
GX = 3 * HP         # gate columns [r | z | n]


def gru_classifier_kernel(tokens_ref, tbl_ref, w_h_ref, b_hn_ref,
                          w_fc_ref, b_fc_ref, out_ref, gx_ref):
    """Fused forward: table gather -> S-step GRU recurrence (h @ W_h only) -> FC.

    tokens_ref : (B, S) int32   SMEM (scalar-prefetched token ids)
    tbl_ref    : (Vp, 3*HP) f32 VMEM per-token x-side gate pre-activations
                                 (emb @ W_i* with all x-side biases folded in)
    w_h_ref    : (HP, 3*HP) bf16 recurrent weight, col blocks [W_hr^T|W_hz^T|W_hn^T]
    b_hn_ref   : (1, HP)    f32  b_hn (only bias not foldable into the table)
    w_fc_ref   : (HP, OP)   bf16 FC weight (transposed, zero-padded)
    b_fc_ref   : (1, OP)    f32  FC bias (zero-padded)
    out_ref    : (B, OP)    f32  fc(final hidden), lane-dense
    gx_ref     : (S, B, 3*HP) f32 VMEM scratch: pre-gathered x-side pre-activations
    """
    B, S = tokens_ref.shape
    Hp = w_h_ref.shape[0]

    # ---- Phase 1 (off the serial chain): gather all S*B table rows up front. ----
    for t in range(S):
        rows = [tbl_ref[pl.ds(tokens_ref[b, t], 1), :] for b in range(B)]
        gx_ref[t] = jnp.concatenate(rows, axis=0)            # (B, 3*Hp)

    # ---- Phase 2: serial recurrence; only h @ W_h is on the critical path. ----
    w_h = w_h_ref[...]                                        # resident, bf16
    b_hn = jnp.broadcast_to(b_hn_ref[...], (B, Hp))           # hoisted broadcast

    def step(t, h):
        gx = gx_ref[t]                                        # (B, 3*Hp) f32
        gh = jnp.dot(h.astype(jnp.bfloat16), w_h,
                     preferred_element_type=jnp.float32)      # (B, 3*Hp) f32
        r = jax.nn.sigmoid(gx[:, 0 * Hp:1 * Hp] + gh[:, 0 * Hp:1 * Hp])
        z = jax.nn.sigmoid(gx[:, 1 * Hp:2 * Hp] + gh[:, 1 * Hp:2 * Hp])
        n = jnp.tanh(gx[:, 2 * Hp:3 * Hp] + r * (gh[:, 2 * Hp:3 * Hp] + b_hn))
        return (1.0 - z) * n + z * h

    h0 = jnp.zeros((B, Hp), jnp.float32)
    h_final = jax.lax.fori_loop(0, S, step, h0, unroll=min(S, 8))

    out_ref[...] = (jnp.dot(h_final.astype(jnp.bfloat16), w_fc_ref[...],
                            preferred_element_type=jnp.float32)
                    + b_fc_ref[...])


def prepare_kernel_params(params):
    """Fold PyTorch-layout GRU params into the kernel's lane-dense layout.

    Embedding lookup and the x-projection commute, so emb @ W_i* (+ all x-side
    biases) is precomputed into one per-token table; only W_h (and b_hn) remain
    in the recurrence.
    """
    emb = params["embedding"]        # (V, H)
    w_ih = params["weight_ih"]       # (3H, H)  gate order [r; z; n]
    w_hh = params["weight_hh"]       # (3H, H)
    b_ih = params["bias_ih"]         # (3H,)
    b_hh = params["bias_hh"]         # (3H,)
    w_fc = params["fc_weight"]       # (O, H)
    b_fc = params["fc_bias"]         # (O,)

    V, H = emb.shape
    O = w_fc.shape[0]
    Vp = ((V + 7) // 8) * 8

    def ih(k):
        return w_ih[k * H:(k + 1) * H]     # (H, H)

    def hh(k):
        return w_hh[k * H:(k + 1) * H]

    # Per-token x-side gate pre-activations (biases folded; b_hn kept separate
    # because it sits inside the r * (...) term).
    gx_r = emb @ ih(0).T + b_ih[0:H] + b_hh[0:H]
    gx_z = emb @ ih(1).T + b_ih[H:2 * H] + b_hh[H:2 * H]
    gx_n = emb @ ih(2).T + b_ih[2 * H:3 * H]
    tbl = jnp.zeros((Vp, GX), jnp.float32)
    tbl = tbl.at[:V, 0 * HP:0 * HP + H].set(gx_r)
    tbl = tbl.at[:V, 1 * HP:1 * HP + H].set(gx_z)
    tbl = tbl.at[:V, 2 * HP:2 * HP + H].set(gx_n)

    # Recurrent weight, lane-dense column blocks [r | z | n]; bf16 MXU operand.
    w_h = jnp.zeros((HP, GX), jnp.float32)
    w_h = w_h.at[:H, 0 * HP:0 * HP + H].set(hh(0).T)
    w_h = w_h.at[:H, 1 * HP:1 * HP + H].set(hh(1).T)
    w_h = w_h.at[:H, 2 * HP:2 * HP + H].set(hh(2).T)
    w_h = w_h.astype(jnp.bfloat16)

    b_hn = jnp.zeros((1, HP), jnp.float32).at[0, :H].set(b_hh[2 * H:3 * H])

    w_fc_pad = (jnp.zeros((HP, OP), jnp.float32)
                .at[:H, :O].set(w_fc.T).astype(jnp.bfloat16))
    b_fc_pad = jnp.zeros((1, OP), jnp.float32).at[0, :O].set(b_fc)

    return dict(tbl=tbl, w_h=w_h, b_hn=b_hn, w_fc=w_fc_pad, b_fc=b_fc_pad, O=O)


def rnn_classifier_forward(tokens, params):
    """Pallas equivalent of RNNClassifier.forward.

    tokens: (B, S) int32 token ids. Returns (n_layers=1, B, output_size).
    """
    kp = prepare_kernel_params(params)
    B, S = tokens.shape
    O = kp["O"]

    grid_spec = pltpu.PrefetchScalarGridSpec(
        num_scalar_prefetch=1,          # tokens -> SMEM
        grid=(1,),                      # single invocation; recurrence in-kernel
        in_specs=[
            pl.BlockSpec(kp["tbl"].shape,  lambda i, tok: (0, 0)),
            pl.BlockSpec(kp["w_h"].shape,  lambda i, tok: (0, 0)),
            pl.BlockSpec(kp["b_hn"].shape, lambda i, tok: (0, 0)),
            pl.BlockSpec(kp["w_fc"].shape, lambda i, tok: (0, 0)),
            pl.BlockSpec(kp["b_fc"].shape, lambda i, tok: (0, 0)),
        ],
        out_specs=pl.BlockSpec((B, OP), lambda i, tok: (0, 0)),
        scratch_shapes=[pltpu.VMEM((S, B, GX), jnp.float32)],
    )

    out_padded = pl.pallas_call(
        gru_classifier_kernel,
        out_shape=jax.ShapeDtypeStruct((B, OP), jnp.float32),
        grid_spec=grid_spec,
        compiler_params=pltpu.CompilerParams(
            dimension_semantics=("arbitrary",)),
    )(tokens.astype(jnp.int32), kp["tbl"], kp["w_h"], kp["b_hn"],
      kp["w_fc"], kp["b_fc"])

    return out_padded[:, :O][None]      # (n_layers=1, B, O)


def make_params(key, input_size, hidden_size, output_size):
    """Deterministic PyTorch-layout params (uniform(-1/sqrt(H), 1/sqrt(H)))."""
    H, V, O = hidden_size, input_size, output_size
    ks = jax.random.split(key, 7)
    bound = 1.0 / jnp.sqrt(jnp.float32(H))
    u = lambda k, shape: jax.random.uniform(k, shape, jnp.float32, -bound, bound)
    return {
        "embedding": jax.random.normal(ks[0], (V, H), jnp.float32),
        "weight_ih": u(ks[1], (3 * H, H)),   # gates [r; z; n]
        "weight_hh": u(ks[2], (3 * H, H)),
        "bias_ih":   u(ks[3], (3 * H,)),
        "bias_hh":   u(ks[4], (3 * H,)),
        "fc_weight": u(ks[5], (O, H)),
        "fc_bias":   u(ks[6], (O,)),
    }


def reference_forward(tokens, params):
    """Pure-JAX f32 reference of the same forward pass (PyTorch GRU semantics)."""
    H = params["embedding"].shape[1]
    emb = params["embedding"][tokens.T]        # (S, B, H)
    w_ih_t = params["weight_ih"].T             # (H, 3H)
    w_hh_t = params["weight_hh"].T
    b_ih, b_hh = params["bias_ih"], params["bias_hh"]
    h0 = jnp.zeros((tokens.shape[0], H), jnp.float32)

    def step(h, x):
        gi = x @ w_ih_t + b_ih
        gh = h @ w_hh_t + b_hh
        i_r, i_z, i_n = gi[:, :H], gi[:, H:2 * H], gi[:, 2 * H:]
        h_r, h_z, h_n = gh[:, :H], gh[:, H:2 * H], gh[:, 2 * H:]
        r = jax.nn.sigmoid(i_r + h_r)
        z = jax.nn.sigmoid(i_z + h_z)
        n = jnp.tanh(i_n + r * h_n)
        return (1.0 - z) * n + z * h, None

    h_final, _ = jax.lax.scan(step, h0, emb)
    return (h_final @ params["fc_weight"].T + params["fc_bias"])[None]


if __name__ == "__main__":
    INPUT_SIZE = 20      # vocab size (nn.Embedding num_embeddings)
    HIDDEN_SIZE = 32
    OUTPUT_SIZE = 5
    BATCH = 2
    SEQ = 8

    key = jax.random.PRNGKey(0)
    k_tok, k_par = jax.random.split(key)
    tokens = jax.random.randint(k_tok, (BATCH, SEQ), 0, INPUT_SIZE, dtype=jnp.int32)
    params = make_params(k_par, INPUT_SIZE, HIDDEN_SIZE, OUTPUT_SIZE)

    out = rnn_classifier_forward(tokens, params)
    out = jax.block_until_ready(out)

    ref = reference_forward(tokens, params)
    assert out.shape == (1, BATCH, OUTPUT_SIZE), out.shape
    # bf16 matmul operands (f32 gate math / accumulation) -> ~1e-3 level error.
    assert jnp.allclose(out, ref, atol=3e-2, rtol=3e-2), (out, ref)

    print("KERNEL_OK")
</pallas_src>

<mosaic_0001>
module attributes {stable_mosaic.version = 11 : i64} {
  func.func @gru_classifier_kernel(%arg0: i32, %arg1: memref<2x8xi32, #tpu.memory_space<smem>>, %arg2: memref<24x384xf32, #tpu.memory_space<vmem>>, %arg3: memref<128x384xbf16, #tpu.memory_space<vmem>>, %arg4: memref<1x128xf32, #tpu.memory_space<vmem>>, %arg5: memref<128x128xbf16, #tpu.memory_space<vmem>>, %arg6: memref<1x128xf32, #tpu.memory_space<vmem>>, %arg7: memref<2x128xf32, #tpu.memory_space<vmem>>, %arg8: memref<8x2x384xf32, #tpu.memory_space<vmem>>) attributes {dimension_semantics = [#tpu.dimension_semantics<arbitrary>], iteration_bounds = array<i64: 1>, scalar_prefetch = 1 : i64, scratch_operands = 1 : i64, tpu.core_type = #tpu.core_type<tc>, window_params = [{pipeline_mode = #tpu.pipeline_mode<synchronous>, transform_indices = @transform_0, window_bounds = array<i64: 24, 384>}, {pipeline_mode = #tpu.pipeline_mode<synchronous>, transform_indices = @transform_1, window_bounds = array<i64: 128, 384>}, {pipeline_mode = #tpu.pipeline_mode<synchronous>, transform_indices = @transform_2, window_bounds = array<i64: 1, 128>}, {pipeline_mode = #tpu.pipeline_mode<synchronous>, transform_indices = @transform_3, window_bounds = array<i64: 128, 128>}, {pipeline_mode = #tpu.pipeline_mode<synchronous>, transform_indices = @transform_4, window_bounds = array<i64: 1, 128>}, {pipeline_mode = #tpu.pipeline_mode<synchronous>, transform_indices = @transform_5, window_bounds = array<i64: 2, 128>}]} {
    %c0 = arith.constant 0 : index
    %c0_0 = arith.constant 0 : index
    %0 = memref.load %arg1[%c0, %c0_0] : memref<2x8xi32, #tpu.memory_space<smem>>
    %1 = arith.index_cast %0 : i32 to index
    %c0_1 = arith.constant 0 : index
    %2 = vector.load %arg2[%1, %c0_1] : memref<24x384xf32, #tpu.memory_space<vmem>>, vector<1x384xf32>
    %c1 = arith.constant 1 : index
    %c0_2 = arith.constant 0 : index
    %3 = memref.load %arg1[%c1, %c0_2] : memref<2x8xi32, #tpu.memory_space<smem>>
    %4 = arith.index_cast %3 : i32 to index
    %c0_3 = arith.constant 0 : index
    %5 = vector.load %arg2[%4, %c0_3] : memref<24x384xf32, #tpu.memory_space<vmem>>, vector<1x384xf32>
    %6 = tpu.concatenate %2, %5 in 0 : vector<1x384xf32>, vector<1x384xf32> -> vector<2x384xf32>
    %c0_4 = arith.constant 0 : index
    %c0_5 = arith.constant 0 : index
    %c0_6 = arith.constant 0 : index
    %7 = vector.load %arg8[%c0_4, %c0_5, %c0_6] : memref<8x2x384xf32, #tpu.memory_space<vmem>>, vector<1x2x384xf32>
    %8 = vector.shape_cast %7 : vector<1x2x384xf32> to vector<2x384xf32>
    %9 = vector.shape_cast %6 : vector<2x384xf32> to vector<1x2x384xf32>
    tpu.vector_store %arg8[%c0_4, %c0_5, %c0_6], %9 {strides = array<i32>} : memref<8x2x384xf32, #tpu.memory_space<vmem>>, vector<1x2x384xf32>,
    %c0_7 = arith.constant 0 : index
    %c1_8 = arith.constant 1 : index
    %10 = memref.load %arg1[%c0_7, %c1_8] : memref<2x8xi32, #tpu.memory_space<smem>>
    %11 = arith.index_cast %10 : i32 to index
    %c0_9 = arith.constant 0 : index
    %12 = vector.load %arg2[%11, %c0_9] : memref<24x384xf32, #tpu.memory_space<vmem>>, vector<1x384xf32>
    %c1_10 = arith.constant 1 : index
    %c1_11 = arith.constant 1 : index
    %13 = memref.load %arg1[%c1_10, %c1_11] : memref<2x8xi32, #tpu.memory_space<smem>>
    %14 = arith.index_cast %13 : i32 to index
    %c0_12 = arith.constant 0 : index
    %15 = vector.load %arg2[%14, %c0_12] : memref<24x384xf32, #tpu.memory_space<vmem>>, vector<1x384xf32>
    %16 = tpu.concatenate %12, %15 in 0 : vector<1x384xf32>, vector<1x384xf32> -> vector<2x384xf32>
    %c1_13 = arith.constant 1 : index
    %c0_14 = arith.constant 0 : index
    %c0_15 = arith.constant 0 : index
    %17 = vector.load %arg8[%c1_13, %c0_14, %c0_15] : memref<8x2x384xf32, #tpu.memory_space<vmem>>, vector<1x2x384xf32>
    %18 = vector.shape_cast %17 : vector<1x2x384xf32> to vector<2x384xf32>
    %19 = vector.shape_cast %16 : vector<2x384xf32> to vector<1x2x384xf32>
    tpu.vector_store %arg8[%c1_13, %c0_14, %c0_15], %19 {strides = array<i32>} : memref<8x2x384xf32, #tpu.memory_space<vmem>>, vector<1x2x384xf32>,
    %c0_16 = arith.constant 0 : index
    %c2 = arith.constant 2 : index
    %20 = memref.load %arg1[%c0_16, %c2] : memref<2x8xi32, #tpu.memory_space<smem>>
    %21 = arith.index_cast %20 : i32 to index
    %c0_17 = arith.constant 0 : index
    %22 = vector.load %arg2[%21, %c0_17] : memref<24x384xf32, #tpu.memory_space<vmem>>, vector<1x384xf32>
    %c1_18 = arith.constant 1 : index
    %c2_19 = arith.constant 2 : index
    %23 = memref.load %arg1[%c1_18, %c2_19] : memref<2x8xi32, #tpu.memory_space<smem>>
    %24 = arith.index_cast %23 : i32 to index
    %c0_20 = arith.constant 0 : index
    %25 = vector.load %arg2[%24, %c0_20] : memref<24x384xf32, #tpu.memory_space<vmem>>, vector<1x384xf32>
    %26 = tpu.concatenate %22, %25 in 0 : vector<1x384xf32>, vector<1x384xf32> -> vector<2x384xf32>
    %c2_21 = arith.constant 2 : index
    %c0_22 = arith.constant 0 : index
    %c0_23 = arith.constant 0 : index
    %27 = vector.load %arg8[%c2_21, %c0_22, %c0_23] : memref<8x2x384xf32, #tpu.memory_space<vmem>>, vector<1x2x384xf32>
    %28 = vector.shape_cast %27 : vector<1x2x384xf32> to vector<2x384xf32>
    %29 = vector.shape_cast %26 : vector<2x384xf32> to vector<1x2x384xf32>
    tpu.vector_store %arg8[%c2_21, %c0_22, %c0_23], %29 {strides = array<i32>} : memref<8x2x384xf32, #tpu.memory_space<vmem>>, vector<1x2x384xf32>,
    %c0_24 = arith.constant 0 : index
    %c3 = arith.constant 3 : index
    %30 = memref.load %arg1[%c0_24, %c3] : memref<2x8xi32, #tpu.memory_space<smem>>
    %31 = arith.index_cast %30 : i32 to index
    %c0_25 = arith.constant 0 : index
    %32 = vector.load %arg2[%31, %c0_25] : memref<24x384xf32, #tpu.memory_space<vmem>>, vector<1x384xf32>
    %c1_26 = arith.constant 1 : index
    %c3_27 = arith.constant 3 : index
    %33 = memref.load %arg1[%c1_26, %c3_27] : memref<2x8xi32, #tpu.memory_space<smem>>
    %34 = arith.index_cast %33 : i32 to index
    %c0_28 = arith.constant 0 : index
    %35 = vector.load %arg2[%34, %c0_28] : memref<24x384xf32, #tpu.memory_space<vmem>>, vector<1x384xf32>
    %36 = tpu.concatenate %32, %35 in 0 : vector<1x384xf32>, vector<1x384xf32> -> vector<2x384xf32>
    %c3_29 = arith.constant 3 : index
    %c0_30 = arith.constant 0 : index
    %c0_31 = arith.constant 0 : index
    %37 = vector.load %arg8[%c3_29, %c0_30, %c0_31] : memref<8x2x384xf32, #tpu.memory_space<vmem>>, vector<1x2x384xf32>
    %38 = vector.shape_cast %37 : vector<1x2x384xf32> to vector<2x384xf32>
    %39 = vector.shape_cast %36 : vector<2x384xf32> to vector<1x2x384xf32>
    tpu.vector_store %arg8[%c3_29, %c0_30, %c0_31], %39 {strides = array<i32>} : memref<8x2x384xf32, #tpu.memory_space<vmem>>, vector<1x2x384xf32>,
    %c0_32 = arith.constant 0 : index
    %c4 = arith.constant 4 : index
    %40 = memref.load %arg1[%c0_32, %c4] : memref<2x8xi32, #tpu.memory_space<smem>>
    %41 = arith.index_cast %40 : i32 to index
    %c0_33 = arith.constant 0 : index
    %42 = vector.load %arg2[%41, %c0_33] : memref<24x384xf32, #tpu.memory_space<vmem>>, vector<1x384xf32>
    %c1_34 = arith.constant 1 : index
    %c4_35 = arith.constant 4 : index
    %43 = memref.load %arg1[%c1_34, %c4_35] : memref<2x8xi32, #tpu.memory_space<smem>>
    %44 = arith.index_cast %43 : i32 to index
    %c0_36 = arith.constant 0 : index
    %45 = vector.load %arg2[%44, %c0_36] : memref<24x384xf32, #tpu.memory_space<vmem>>, vector<1x384xf32>
    %46 = tpu.concatenate %42, %45 in 0 : vector<1x384xf32>, vector<1x384xf32> -> vector<2x384xf32>
    %c4_37 = arith.constant 4 : index
    %c0_38 = arith.constant 0 : index
    %c0_39 = arith.constant 0 : index
    %47 = vector.load %arg8[%c4_37, %c0_38, %c0_39] : memref<8x2x384xf32, #tpu.memory_space<vmem>>, vector<1x2x384xf32>
    %48 = vector.shape_cast %47 : vector<1x2x384xf32> to vector<2x384xf32>
    %49 = vector.shape_cast %46 : vector<2x384xf32> to vector<1x2x384xf32>
    tpu.vector_store %arg8[%c4_37, %c0_38, %c0_39], %49 {strides = array<i32>} : memref<8x2x384xf32, #tpu.memory_space<vmem>>, vector<1x2x384xf32>,
    %c0_40 = arith.constant 0 : index
    %c5 = arith.constant 5 : index
    %50 = memref.load %arg1[%c0_40, %c5] : memref<2x8xi32, #tpu.memory_space<smem>>
    %51 = arith.index_cast %50 : i32 to index
    %c0_41 = arith.constant 0 : index
    %52 = vector.load %arg2[%51, %c0_41] : memref<24x384xf32, #tpu.memory_space<vmem>>, vector<1x384xf32>
    %c1_42 = arith.constant 1 : index
    %c5_43 = arith.constant 5 : index
    %53 = memref.load %arg1[%c1_42, %c5_43] : memref<2x8xi32, #tpu.memory_space<smem>>
    %54 = arith.index_cast %53 : i32 to index
    %c0_44 = arith.constant 0 : index
    %55 = vector.load %arg2[%54, %c0_44] : memref<24x384xf32, #tpu.memory_space<vmem>>, vector<1x384xf32>
    %56 = tpu.concatenate %52, %55 in 0 : vector<1x384xf32>, vector<1x384xf32> -> vector<2x384xf32>
    %c5_45 = arith.constant 5 : index
    %c0_46 = arith.constant 0 : index
    %c0_47 = arith.constant 0 : index
    %57 = vector.load %arg8[%c5_45, %c0_46, %c0_47] : memref<8x2x384xf32, #tpu.memory_space<vmem>>, vector<1x2x384xf32>
    %58 = vector.shape_cast %57 : vector<1x2x384xf32> to vector<2x384xf32>
    %59 = vector.shape_cast %56 : vector<2x384xf32> to vector<1x2x384xf32>
    tpu.vector_store %arg8[%c5_45, %c0_46, %c0_47], %59 {strides = array<i32>} : memref<8x2x384xf32, #tpu.memory_space<vmem>>, vector<1x2x384xf32>,
    %c0_48 = arith.constant 0 : index
    %c6 = arith.constant 6 : index
    %60 = memref.load %arg1[%c0_48, %c6] : memref<2x8xi32, #tpu.memory_space<smem>>
    %61 = arith.index_cast %60 : i32 to index
    %c0_49 = arith.constant 0 : index
    %62 = vector.load %arg2[%61, %c0_49] : memref<24x384xf32, #tpu.memory_space<vmem>>, vector<1x384xf32>
    %c1_50 = arith.constant 1 : index
    %c6_51 = arith.constant 6 : index
    %63 = memref.load %arg1[%c1_50, %c6_51] : memref<2x8xi32, #tpu.memory_space<smem>>
    %64 = arith.index_cast %63 : i32 to index
    %c0_52 = arith.constant 0 : index
    %65 = vector.load %arg2[%64, %c0_52] : memref<24x384xf32, #tpu.memory_space<vmem>>, vector<1x384xf32>
    %66 = tpu.concatenate %62, %65 in 0 : vector<1x384xf32>, vector<1x384xf32> -> vector<2x384xf32>
    %c6_53 = arith.constant 6 : index
    %c0_54 = arith.constant 0 : index
    %c0_55 = arith.constant 0 : index
    %67 = vector.load %arg8[%c6_53, %c0_54, %c0_55] : memref<8x2x384xf32, #tpu.memory_space<vmem>>, vector<1x2x384xf32>
    %68 = vector.shape_cast %67 : vector<1x2x384xf32> to vector<2x384xf32>
    %69 = vector.shape_cast %66 : vector<2x384xf32> to vector<1x2x384xf32>
    tpu.vector_store %arg8[%c6_53, %c0_54, %c0_55], %69 {strides = array<i32>} : memref<8x2x384xf32, #tpu.memory_space<vmem>>, vector<1x2x384xf32>,
    %c0_56 = arith.constant 0 : index
    %c7 = arith.constant 7 : index
    %70 = memref.load %arg1[%c0_56, %c7] : memref<2x8xi32, #tpu.memory_space<smem>>
    %71 = arith.index_cast %70 : i32 to index
    %c0_57 = arith.constant 0 : index
    %72 = vector.load %arg2[%71, %c0_57] : memref<24x384xf32, #tpu.memory_space<vmem>>, vector<1x384xf32>
    %c1_58 = arith.constant 1 : index
    %c7_59 = arith.constant 7 : index
    %73 = memref.load %arg1[%c1_58, %c7_59] : memref<2x8xi32, #tpu.memory_space<smem>>
    %74 = arith.index_cast %73 : i32 to index
    %c0_60 = arith.constant 0 : index
    %75 = vector.load %arg2[%74, %c0_60] : memref<24x384xf32, #tpu.memory_space<vmem>>, vector<1x384xf32>
    %76 = tpu.concatenate %72, %75 in 0 : vector<1x384xf32>, vector<1x384xf32> -> vector<2x384xf32>
    %c7_61 = arith.constant 7 : index
    %c0_62 = arith.constant 0 : index
    %c0_63 = arith.constant 0 : index
    %77 = vector.load %arg8[%c7_61, %c0_62, %c0_63] : memref<8x2x384xf32, #tpu.memory_space<vmem>>, vector<1x2x384xf32>
    %78 = vector.shape_cast %77 : vector<1x2x384xf32> to vector<2x384xf32>
    %79 = vector.shape_cast %76 : vector<2x384xf32> to vector<1x2x384xf32>
    tpu.vector_store %arg8[%c7_61, %c0_62, %c0_63], %79 {strides = array<i32>} : memref<8x2x384xf32, #tpu.memory_space<vmem>>, vector<1x2x384xf32>,
    %c0_64 = arith.constant 0 : index
    %c0_65 = arith.constant 0 : index
    %80 = vector.load %arg3[%c0_64, %c0_65] : memref<128x384xbf16, #tpu.memory_space<vmem>>, vector<128x384xbf16>
    %c0_66 = arith.constant 0 : index
    %c0_67 = arith.constant 0 : index
    %81 = vector.load %arg4[%c0_66, %c0_67] : memref<1x128xf32, #tpu.memory_space<vmem>>, vector<1x128xf32>
    %82 = vector.shape_cast %81 : vector<1x128xf32> to vector<1x128xf32>
    %83 = vector.broadcast %82 : vector<1x128xf32> to vector<2x128xf32>
    %cst = arith.constant 0.000000e+00 : f32
    %84 = vector.broadcast %cst : f32 to vector<2x128xf32>
    %c0_i32 = arith.constant 0 : i32
    %85 = arith.index_cast %c0_i32 : i32 to index
    %c0_68 = arith.constant 0 : index
    %c0_69 = arith.constant 0 : index
    %86 = vector.load %arg8[%85, %c0_68, %c0_69] : memref<8x2x384xf32, #tpu.memory_space<vmem>>, vector<1x2x384xf32>
    %87 = vector.shape_cast %86 : vector<1x2x384xf32> to vector<2x384xf32>
    %88 = arith.truncf %84 : vector<2x128xf32> to vector<2x128xbf16>
    %cst_70 = arith.constant dense<0.000000e+00> : vector<2x384xf32>
    %89 = tpu.matmul %88, %80, %cst_70 {dimension_numbers = #tpu.dot_dimension_numbers<[1], [0], [0], [1], [0, 0, 1, 1], [], []>} : vector<2x128xbf16>, vector<128x384xbf16>, vector<2x384xf32> -> vector<2x384xf32>
    %90 = vector.extract_strided_slice %87 {offsets = [0, 0], sizes = [2, 128], strides = [1, 1]} : vector<2x384xf32> to vector<2x128xf32>
    %91 = vector.extract_strided_slice %89 {offsets = [0, 0], sizes = [2, 128], strides = [1, 1]} : vector<2x384xf32> to vector<2x128xf32>
    %92 = arith.addf %90, %91 : vector<2x128xf32>
    %93 = arith.negf %92 : vector<2x128xf32>
    %94 = math.exp %93 : vector<2x128xf32>
    %cst_71 = arith.constant 1.000000e+00 : f32
    %95 = vector.broadcast %cst_71 : f32 to vector<2x128xf32>
    %96 = arith.addf %95, %94 : vector<2x128xf32>
    %97 = arith.divf %95, %96 : vector<2x128xf32>
    %98 = vector.extract_strided_slice %87 {offsets = [0, 128], sizes = [2, 128], strides = [1, 1]} : vector<2x384xf32> to vector<2x128xf32>
    %99 = vector.extract_strided_slice %89 {offsets = [0, 128], sizes = [2, 128], strides = [1, 1]} : vector<2x384xf32> to vector<2x128xf32>
    %100 = arith.addf %98, %99 : vector<2x128xf32>
    %101 = arith.negf %100 : vector<2x128xf32>
    %102 = math.exp %101 : vector<2x128xf32>
    %cst_72 = arith.constant 1.000000e+00 : f32
    %103 = vector.broadcast %cst_72 : f32 to vector<2x128xf32>
    %104 = arith.addf %103, %102 : vector<2x128xf32>
    %105 = arith.divf %103, %104 : vector<2x128xf32>
    %106 = vector.extract_strided_slice %87 {offsets = [0, 256], sizes = [2, 128], strides = [1, 1]} : vector<2x384xf32> to vector<2x128xf32>
    %107 = vector.extract_strided_slice %89 {offsets = [0, 256], sizes = [2, 128], strides = [1, 1]} : vector<2x384xf32> to vector<2x128xf32>
    %108 = arith.addf %107, %83 : vector<2x128xf32>
    %109 = arith.mulf %97, %108 : vector<2x128xf32>
    %110 = arith.addf %106, %109 : vector<2x128xf32>
    %111 = math.tanh %110 : vector<2x128xf32>
    %cst_73 = arith.constant 1.000000e+00 : f32
    %112 = vector.broadcast %cst_73 : f32 to vector<2x128xf32>
    %113 = arith.subf %112, %105 : vector<2x128xf32>
    %114 = arith.mulf %113, %111 : vector<2x128xf32>
    %115 = arith.mulf %105, %84 : vector<2x128xf32>
    %116 = arith.addf %114, %115 : vector<2x128xf32>
    %c1_i32 = arith.constant 1 : i32
    %117 = arith.index_cast %c1_i32 : i32 to index
    %c0_74 = arith.constant 0 : index
    %c0_75 = arith.constant 0 : index
    %118 = vector.load %arg8[%117, %c0_74, %c0_75] : memref<8x2x384xf32, #tpu.memory_space<vmem>>, vector<1x2x384xf32>
    %119 = vector.shape_cast %118 : vector<1x2x384xf32> to vector<2x384xf32>
    %120 = arith.truncf %116 : vector<2x128xf32> to vector<2x128xbf16>
    %cst_76 = arith.constant dense<0.000000e+00> : vector<2x384xf32>
    %121 = tpu.matmul %120, %80, %cst_76 {dimension_numbers = #tpu.dot_dimension_numbers<[1], [0], [0], [1], [0, 0, 1, 1], [], []>} : vector<2x128xbf16>, vector<128x384xbf16>, vector<2x384xf32> -> vector<2x384xf32>
    %122 = vector.extract_strided_slice %119 {offsets = [0, 0], sizes = [2, 128], strides = [1, 1]} : vector<2x384xf32> to vector<2x128xf32>
    %123 = vector.extract_strided_slice %121 {offsets = [0, 0], sizes = [2, 128], strides = [1, 1]} : vector<2x384xf32> to vector<2x128xf32>
    %124 = arith.addf %122, %123 : vector<2x128xf32>
    %125 = arith.negf %124 : vector<2x128xf32>
    %126 = math.exp %125 : vector<2x128xf32>
    %cst_77 = arith.constant 1.000000e+00 : f32
    %127 = vector.broadcast %cst_77 : f32 to vector<2x128xf32>
    %128 = arith.addf %127, %126 : vector<2x128xf32>
    %129 = arith.divf %127, %128 : vector<2x128xf32>
    %130 = vector.extract_strided_slice %119 {offsets = [0, 128], sizes = [2, 128], strides = [1, 1]} : vector<2x384xf32> to vector<2x128xf32>
    %131 = vector.extract_strided_slice %121 {offsets = [0, 128], sizes = [2, 128], strides = [1, 1]} : vector<2x384xf32> to vector<2x128xf32>
    %132 = arith.addf %130, %131 : vector<2x128xf32>
    %133 = arith.negf %132 : vector<2x128xf32>
    %134 = math.exp %133 : vector<2x128xf32>
    %cst_78 = arith.constant 1.000000e+00 : f32
    %135 = vector.broadcast %cst_78 : f32 to vector<2x128xf32>
    %136 = arith.addf %135, %134 : vector<2x128xf32>
    %137 = arith.divf %135, %136 : vector<2x128xf32>
    %138 = vector.extract_strided_slice %119 {offsets = [0, 256], sizes = [2, 128], strides = [1, 1]} : vector<2x384xf32> to vector<2x128xf32>
    %139 = vector.extract_strided_slice %121 {offsets = [0, 256], sizes = [2, 128], strides = [1, 1]} : vector<2x384xf32> to vector<2x128xf32>
    %140 = arith.addf %139, %83 : vector<2x128xf32>
    %141 = arith.mulf %129, %140 : vector<2x128xf32>
    %142 = arith.addf %138, %141 : vector<2x128xf32>
    %143 = math.tanh %142 : vector<2x128xf32>
    %cst_79 = arith.constant 1.000000e+00 : f32
    %144 = vector.broadcast %cst_79 : f32 to vector<2x128xf32>
    %145 = arith.subf %144, %137 : vector<2x128xf32>
    %146 = arith.mulf %145, %143 : vector<2x128xf32>
    %147 = arith.mulf %137, %116 : vector<2x128xf32>
    %148 = arith.addf %146, %147 : vector<2x128xf32>
    %c2_i32 = arith.constant 2 : i32
    %149 = arith.index_cast %c2_i32 : i32 to index
    %c0_80 = arith.constant 0 : index
    %c0_81 = arith.constant 0 : index
    %150 = vector.load %arg8[%149, %c0_80, %c0_81] : memref<8x2x384xf32, #tpu.memory_space<vmem>>, vector<1x2x384xf32>
    %151 = vector.shape_cast %150 : vector<1x2x384xf32> to vector<2x384xf32>
    %152 = arith.truncf %148 : vector<2x128xf32> to vector<2x128xbf16>
    %cst_82 = arith.constant dense<0.000000e+00> : vector<2x384xf32>
    %153 = tpu.matmul %152, %80, %cst_82 {dimension_numbers = #tpu.dot_dimension_numbers<[1], [0], [0], [1], [0, 0, 1, 1], [], []>} : vector<2x128xbf16>, vector<128x384xbf16>, vector<2x384xf32> -> vector<2x384xf32>
    %154 = vector.extract_strided_slice %151 {offsets = [0, 0], sizes = [2, 128], strides = [1, 1]} : vector<2x384xf32> to vector<2x128xf32>
    %155 = vector.extract_strided_slice %153 {offsets = [0, 0], sizes = [2, 128], strides = [1, 1]} : vector<2x384xf32> to vector<2x128xf32>
    %156 = arith.addf %154, %155 : vector<2x128xf32>
    %157 = arith.negf %156 : vector<2x128xf32>
    %158 = math.exp %157 : vector<2x128xf32>
    %cst_83 = arith.constant 1.000000e+00 : f32
    %159 = vector.broadcast %cst_83 : f32 to vector<2x128xf32>
    %160 = arith.addf %159, %158 : vector<2x128xf32>
    %161 = arith.divf %159, %160 : vector<2x128xf32>
    %162 = vector.extract_strided_slice %151 {offsets = [0, 128], sizes = [2, 128], strides = [1, 1]} : vector<2x384xf32> to vector<2x128xf32>
    %163 = vector.extract_strided_slice %153 {offsets = [0, 128], sizes = [2, 128], strides = [1, 1]} : vector<2x384xf32> to vector<2x128xf32>
    %164 = arith.addf %162, %163 : vector<2x128xf32>
    %165 = arith.negf %164 : vector<2x128xf32>
    %166 = math.exp %165 : vector<2x128xf32>
    %cst_84 = arith.constant 1.000000e+00 : f32
    %167 = vector.broadcast %cst_84 : f32 to vector<2x128xf32>
    %168 = arith.addf %167, %166 : vector<2x128xf32>
    %169 = arith.divf %167, %168 : vector<2x128xf32>
    %170 = vector.extract_strided_slice %151 {offsets = [0, 256], sizes = [2, 128], strides = [1, 1]} : vector<2x384xf32> to vector<2x128xf32>
    %171 = vector.extract_strided_slice %153 {offsets = [0, 256], sizes = [2, 128], strides = [1, 1]} : vector<2x384xf32> to vector<2x128xf32>
    %172 = arith.addf %171, %83 : vector<2x128xf32>
    %173 = arith.mulf %161, %172 : vector<2x128xf32>
    %174 = arith.addf %170, %173 : vector<2x128xf32>
    %175 = math.tanh %174 : vector<2x128xf32>
    %cst_85 = arith.constant 1.000000e+00 : f32
    %176 = vector.broadcast %cst_85 : f32 to vector<2x128xf32>
    %177 = arith.subf %176, %169 : vector<2x128xf32>
    %178 = arith.mulf %177, %175 : vector<2x128xf32>
    %179 = arith.mulf %169, %148 : vector<2x128xf32>
    %180 = arith.addf %178, %179 : vector<2x128xf32>
    %c3_i32 = arith.constant 3 : i32
    %181 = arith.index_cast %c3_i32 : i32 to index
    %c0_86 = arith.constant 0 : index
    %c0_87 = arith.constant 0 : index
    %182 = vector.load %arg8[%181, %c0_86, %c0_87] : memref<8x2x384xf32, #tpu.memory_space<vmem>>, vector<1x2x384xf32>
    %183 = vector.shape_cast %182 : vector<1x2x384xf32> to vector<2x384xf32>
    %184 = arith.truncf %180 : vector<2x128xf32> to vector<2x128xbf16>
    %cst_88 = arith.constant dense<0.000000e+00> : vector<2x384xf32>
    %185 = tpu.matmul %184, %80, %cst_88 {dimension_numbers = #tpu.dot_dimension_numbers<[1], [0], [0], [1], [0, 0, 1, 1], [], []>} : vector<2x128xbf16>, vector<128x384xbf16>, vector<2x384xf32> -> vector<2x384xf32>
    %186 = vector.extract_strided_slice %183 {offsets = [0, 0], sizes = [2, 128], strides = [1, 1]} : vector<2x384xf32> to vector<2x128xf32>
    %187 = vector.extract_strided_slice %185 {offsets = [0, 0], sizes = [2, 128], strides = [1, 1]} : vector<2x384xf32> to vector<2x128xf32>
    %188 = arith.addf %186, %187 : vector<2x128xf32>
    %189 = arith.negf %188 : vector<2x128xf32>
    %190 = math.exp %189 : vector<2x128xf32>
    %cst_89 = arith.constant 1.000000e+00 : f32
    %191 = vector.broadcast %cst_89 : f32 to vector<2x128xf32>
    %192 = arith.addf %191, %190 : vector<2x128xf32>
    %193 = arith.divf %191, %192 : vector<2x128xf32>
    %194 = vector.extract_strided_slice %183 {offsets = [0, 128], sizes = [2, 128], strides = [1, 1]} : vector<2x384xf32> to vector<2x128xf32>
    %195 = vector.extract_strided_slice %185 {offsets = [0, 128], sizes = [2, 128], strides = [1, 1]} : vector<2x384xf32> to vector<2x128xf32>
    %196 = arith.addf %194, %195 : vector<2x128xf32>
    %197 = arith.negf %196 : vector<2x128xf32>
    %198 = math.exp %197 : vector<2x128xf32>
    %cst_90 = arith.constant 1.000000e+00 : f32
    %199 = vector.broadcast %cst_90 : f32 to vector<2x128xf32>
    %200 = arith.addf %199, %198 : vector<2x128xf32>
    %201 = arith.divf %199, %200 : vector<2x128xf32>
    %202 = vector.extract_strided_slice %183 {offsets = [0, 256], sizes = [2, 128], strides = [1, 1]} : vector<2x384xf32> to vector<2x128xf32>
    %203 = vector.extract_strided_slice %185 {offsets = [0, 256], sizes = [2, 128], strides = [1, 1]} : vector<2x384xf32> to vector<2x128xf32>
    %204 = arith.addf %203, %83 : vector<2x128xf32>
    %205 = arith.mulf %193, %204 : vector<2x128xf32>
    %206 = arith.addf %202, %205 : vector<2x128xf32>
    %207 = math.tanh %206 : vector<2x128xf32>
    %cst_91 = arith.constant 1.000000e+00 : f32
    %208 = vector.broadcast %cst_91 : f32 to vector<2x128xf32>
    %209 = arith.subf %208, %201 : vector<2x128xf32>
    %210 = arith.mulf %209, %207 : vector<2x128xf32>
    %211 = arith.mulf %201, %180 : vector<2x128xf32>
    %212 = arith.addf %210, %211 : vector<2x128xf32>
    %c4_i32 = arith.constant 4 : i32
    %213 = arith.index_cast %c4_i32 : i32 to index
    %c0_92 = arith.constant 0 : index
    %c0_93 = arith.constant 0 : index
    %214 = vector.load %arg8[%213, %c0_92, %c0_93] : memref<8x2x384xf32, #tpu.memory_space<vmem>>, vector<1x2x384xf32>
    %215 = vector.shape_cast %214 : vector<1x2x384xf32> to vector<2x384xf32>
    %216 = arith.truncf %212 : vector<2x128xf32> to vector<2x128xbf16>
    %cst_94 = arith.constant dense<0.000000e+00> : vector<2x384xf32>
    %217 = tpu.matmul %216, %80, %cst_94 {dimension_numbers = #tpu.dot_dimension_numbers<[1], [0], [0], [1], [0, 0, 1, 1], [], []>} : vector<2x128xbf16>, vector<128x384xbf16>, vector<2x384xf32> -> vector<2x384xf32>
    %218 = vector.extract_strided_slice %215 {offsets = [0, 0], sizes = [2, 128], strides = [1, 1]} : vector<2x384xf32> to vector<2x128xf32>
    %219 = vector.extract_strided_slice %217 {offsets = [0, 0], sizes = [2, 128], strides = [1, 1]} : vector<2x384xf32> to vector<2x128xf32>
    %220 = arith.addf %218, %219 : vector<2x128xf32>
    %221 = arith.negf %220 : vector<2x128xf32>
    %222 = math.exp %221 : vector<2x128xf32>
    %cst_95 = arith.constant 1.000000e+00 : f32
    %223 = vector.broadcast %cst_95 : f32 to vector<2x128xf32>
    %224 = arith.addf %223, %222 : vector<2x128xf32>
    %225 = arith.divf %223, %224 : vector<2x128xf32>
    %226 = vector.extract_strided_slice %215 {offsets = [0, 128], sizes = [2, 128], strides = [1, 1]} : vector<2x384xf32> to vector<2x128xf32>
    %227 = vector.extract_strided_slice %217 {offsets = [0, 128], sizes = [2, 128], strides = [1, 1]} : vector<2x384xf32> to vector<2x128xf32>
    %228 = arith.addf %226, %227 : vector<2x128xf32>
    %229 = arith.negf %228 : vector<2x128xf32>
    %230 = math.exp %229 : vector<2x128xf32>
    %cst_96 = arith.constant 1.000000e+00 : f32
    %231 = vector.broadcast %cst_96 : f32 to vector<2x128xf32>
    %232 = arith.addf %231, %230 : vector<2x128xf32>
    %233 = arith.divf %231, %232 : vector<2x128xf32>
    %234 = vector.extract_strided_slice %215 {offsets = [0, 256], sizes = [2, 128], strides = [1, 1]} : vector<2x384xf32> to vector<2x128xf32>
    %235 = vector.extract_strided_slice %217 {offsets = [0, 256], sizes = [2, 128], strides = [1, 1]} : vector<2x384xf32> to vector<2x128xf32>
    %236 = arith.addf %235, %83 : vector<2x128xf32>
    %237 = arith.mulf %225, %236 : vector<2x128xf32>
    %238 = arith.addf %234, %237 : vector<2x128xf32>
    %239 = math.tanh %238 : vector<2x128xf32>
    %cst_97 = arith.constant 1.000000e+00 : f32
    %240 = vector.broadcast %cst_97 : f32 to vector<2x128xf32>
    %241 = arith.subf %240, %233 : vector<2x128xf32>
    %242 = arith.mulf %241, %239 : vector<2x128xf32>
    %243 = arith.mulf %233, %212 : vector<2x128xf32>
    %244 = arith.addf %242, %243 : vector<2x128xf32>
    %c5_i32 = arith.constant 5 : i32
    %245 = arith.index_cast %c5_i32 : i32 to index
    %c0_98 = arith.constant 0 : index
    %c0_99 = arith.constant 0 : index
    %246 = vector.load %arg8[%245, %c0_98, %c0_99] : memref<8x2x384xf32, #tpu.memory_space<vmem>>, vector<1x2x384xf32>
    %247 = vector.shape_cast %246 : vector<1x2x384xf32> to vector<2x384xf32>
    %248 = arith.truncf %244 : vector<2x128xf32> to vector<2x128xbf16>
    %cst_100 = arith.constant dense<0.000000e+00> : vector<2x384xf32>
    %249 = tpu.matmul %248, %80, %cst_100 {dimension_numbers = #tpu.dot_dimension_numbers<[1], [0], [0], [1], [0, 0, 1, 1], [], []>} : vector<2x128xbf16>, vector<128x384xbf16>, vector<2x384xf32> -> vector<2x384xf32>
    %250 = vector.extract_strided_slice %247 {offsets = [0, 0], sizes = [2, 128], strides = [1, 1]} : vector<2x384xf32> to vector<2x128xf32>
    %251 = vector.extract_strided_slice %249 {offsets = [0, 0], sizes = [2, 128], strides = [1, 1]} : vector<2x384xf32> to vector<2x128xf32>
    %252 = arith.addf %250, %251 : vector<2x128xf32>
    %253 = arith.negf %252 : vector<2x128xf32>
    %254 = math.exp %253 : vector<2x128xf32>
    %cst_101 = arith.constant 1.000000e+00 : f32
    %255 = vector.broadcast %cst_101 : f32 to vector<2x128xf32>
    %256 = arith.addf %255, %254 : vector<2x128xf32>
    %257 = arith.divf %255, %256 : vector<2x128xf32>
    %258 = vector.extract_strided_slice %247 {offsets = [0, 128], sizes = [2, 128], strides = [1, 1]} : vector<2x384xf32> to vector<2x128xf32>
    %259 = vector.extract_strided_slice %249 {offsets = [0, 128], sizes = [2, 128], strides = [1, 1]} : vector<2x384xf32> to vector<2x128xf32>
    %260 = arith.addf %258, %259 : vector<2x128xf32>
    %261 = arith.negf %260 : vector<2x128xf32>
    %262 = math.exp %261 : vector<2x128xf32>
    %cst_102 = arith.constant 1.000000e+00 : f32
    %263 = vector.broadcast %cst_102 : f32 to vector<2x128xf32>
    %264 = arith.addf %263, %262 : vector<2x128xf32>
    %265 = arith.divf %263, %264 : vector<2x128xf32>
    %266 = vector.extract_strided_slice %247 {offsets = [0, 256], sizes = [2, 128], strides = [1, 1]} : vector<2x384xf32> to vector<2x128xf32>
    %267 = vector.extract_strided_slice %249 {offsets = [0, 256], sizes = [2, 128], strides = [1, 1]} : vector<2x384xf32> to vector<2x128xf32>
    %268 = arith.addf %267, %83 : vector<2x128xf32>
    %269 = arith.mulf %257, %268 : vector<2x128xf32>
    %270 = arith.addf %266, %269 : vector<2x128xf32>
    %271 = math.tanh %270 : vector<2x128xf32>
    %cst_103 = arith.constant 1.000000e+00 : f32
    %272 = vector.broadcast %cst_103 : f32 to vector<2x128xf32>
    %273 = arith.subf %272, %265 : vector<2x128xf32>
    %274 = arith.mulf %273, %271 : vector<2x128xf32>
    %275 = arith.mulf %265, %244 : vector<2x128xf32>
    %276 = arith.addf %274, %275 : vector<2x128xf32>
    %c6_i32 = arith.constant 6 : i32
    %277 = arith.index_cast %c6_i32 : i32 to index
    %c0_104 = arith.constant 0 : index
    %c0_105 = arith.constant 0 : index
    %278 = vector.load %arg8[%277, %c0_104, %c0_105] : memref<8x2x384xf32, #tpu.memory_space<vmem>>, vector<1x2x384xf32>
    %279 = vector.shape_cast %278 : vector<1x2x384xf32> to vector<2x384xf32>
    %280 = arith.truncf %276 : vector<2x128xf32> to vector<2x128xbf16>
    %cst_106 = arith.constant dense<0.000000e+00> : vector<2x384xf32>
    %281 = tpu.matmul %280, %80, %cst_106 {dimension_numbers = #tpu.dot_dimension_numbers<[1], [0], [0], [1], [0, 0, 1, 1], [], []>} : vector<2x128xbf16>, vector<128x384xbf16>, vector<2x384xf32> -> vector<2x384xf32>
    %282 = vector.extract_strided_slice %279 {offsets = [0, 0], sizes = [2, 128], strides = [1, 1]} : vector<2x384xf32> to vector<2x128xf32>
    %283 = vector.extract_strided_slice %281 {offsets = [0, 0], sizes = [2, 128], strides = [1, 1]} : vector<2x384xf32> to vector<2x128xf32>
    %284 = arith.addf %282, %283 : vector<2x128xf32>
    %285 = arith.negf %284 : vector<2x128xf32>
    %286 = math.exp %285 : vector<2x128xf32>
    %cst_107 = arith.constant 1.000000e+00 : f32
    %287 = vector.broadcast %cst_107 : f32 to vector<2x128xf32>
    %288 = arith.addf %287, %286 : vector<2x128xf32>
    %289 = arith.divf %287, %288 : vector<2x128xf32>
    %290 = vector.extract_strided_slice %279 {offsets = [0, 128], sizes = [2, 128], strides = [1, 1]} : vector<2x384xf32> to vector<2x128xf32>
    %291 = vector.extract_strided_slice %281 {offsets = [0, 128], sizes = [2, 128], strides = [1, 1]} : vector<2x384xf32> to vector<2x128xf32>
    %292 = arith.addf %290, %291 : vector<2x128xf32>
    %293 = arith.negf %292 : vector<2x128xf32>
    %294 = math.exp %293 : vector<2x128xf32>
    %cst_108 = arith.constant 1.000000e+00 : f32
    %295 = vector.broadcast %cst_108 : f32 to vector<2x128xf32>
    %296 = arith.addf %295, %294 : vector<2x128xf32>
    %297 = arith.divf %295, %296 : vector<2x128xf32>
    %298 = vector.extract_strided_slice %279 {offsets = [0, 256], sizes = [2, 128], strides = [1, 1]} : vector<2x384xf32> to vector<2x128xf32>
    %299 = vector.extract_strided_slice %281 {offsets = [0, 256], sizes = [2, 128], strides = [1, 1]} : vector<2x384xf32> to vector<2x128xf32>
    %300 = arith.addf %299, %83 : vector<2x128xf32>
    %301 = arith.mulf %289, %300 : vector<2x128xf32>
    %302 = arith.addf %298, %301 : vector<2x128xf32>
    %303 = math.tanh %302 : vector<2x128xf32>
    %cst_109 = arith.constant 1.000000e+00 : f32
    %304 = vector.broadcast %cst_109 : f32 to vector<2x128xf32>
    %305 = arith.subf %304, %297 : vector<2x128xf32>
    %306 = arith.mulf %305, %303 : vector<2x128xf32>
    %307 = arith.mulf %297, %276 : vector<2x128xf32>
    %308 = arith.addf %306, %307 : vector<2x128xf32>
    %c7_i32 = arith.constant 7 : i32
    %309 = arith.index_cast %c7_i32 : i32 to index
    %c0_110 = arith.constant 0 : index
    %c0_111 = arith.constant 0 : index
    %310 = vector.load %arg8[%309, %c0_110, %c0_111] : memref<8x2x384xf32, #tpu.memory_space<vmem>>, vector<1x2x384xf32>
    %311 = vector.shape_cast %310 : vector<1x2x384xf32> to vector<2x384xf32>
    %312 = arith.truncf %308 : vector<2x128xf32> to vector<2x128xbf16>
    %cst_112 = arith.constant dense<0.000000e+00> : vector<2x384xf32>
    %313 = tpu.matmul %312, %80, %cst_112 {dimension_numbers = #tpu.dot_dimension_numbers<[1], [0], [0], [1], [0, 0, 1, 1], [], []>} : vector<2x128xbf16>, vector<128x384xbf16>, vector<2x384xf32> -> vector<2x384xf32>
    %314 = vector.extract_strided_slice %311 {offsets = [0, 0], sizes = [2, 128], strides = [1, 1]} : vector<2x384xf32> to vector<2x128xf32>
    %315 = vector.extract_strided_slice %313 {offsets = [0, 0], sizes = [2, 128], strides = [1, 1]} : vector<2x384xf32> to vector<2x128xf32>
    %316 = arith.addf %314, %315 : vector<2x128xf32>
    %317 = arith.negf %316 : vector<2x128xf32>
    %318 = math.exp %317 : vector<2x128xf32>
    %cst_113 = arith.constant 1.000000e+00 : f32
    %319 = vector.broadcast %cst_113 : f32 to vector<2x128xf32>
    %320 = arith.addf %319, %318 : vector<2x128xf32>
    %321 = arith.divf %319, %320 : vector<2x128xf32>
    %322 = vector.extract_strided_slice %311 {offsets = [0, 128], sizes = [2, 128], strides = [1, 1]} : vector<2x384xf32> to vector<2x128xf32>
    %323 = vector.extract_strided_slice %313 {offsets = [0, 128], sizes = [2, 128], strides = [1, 1]} : vector<2x384xf32> to vector<2x128xf32>
    %324 = arith.addf %322, %323 : vector<2x128xf32>
    %325 = arith.negf %324 : vector<2x128xf32>
    %326 = math.exp %325 : vector<2x128xf32>
    %cst_114 = arith.constant 1.000000e+00 : f32
    %327 = vector.broadcast %cst_114 : f32 to vector<2x128xf32>
    %328 = arith.addf %327, %326 : vector<2x128xf32>
    %329 = arith.divf %327, %328 : vector<2x128xf32>
    %330 = vector.extract_strided_slice %311 {offsets = [0, 256], sizes = [2, 128], strides = [1, 1]} : vector<2x384xf32> to vector<2x128xf32>
    %331 = vector.extract_strided_slice %313 {offsets = [0, 256], sizes = [2, 128], strides = [1, 1]} : vector<2x384xf32> to vector<2x128xf32>
    %332 = arith.addf %331, %83 : vector<2x128xf32>
    %333 = arith.mulf %321, %332 : vector<2x128xf32>
    %334 = arith.addf %330, %333 : vector<2x128xf32>
    %335 = math.tanh %334 : vector<2x128xf32>
    %cst_115 = arith.constant 1.000000e+00 : f32
    %336 = vector.broadcast %cst_115 : f32 to vector<2x128xf32>
    %337 = arith.subf %336, %329 : vector<2x128xf32>
    %338 = arith.mulf %337, %335 : vector<2x128xf32>
    %339 = arith.mulf %329, %308 : vector<2x128xf32>
    %340 = arith.addf %338, %339 : vector<2x128xf32>
    %c8_i32 = arith.constant 8 : i32
    %341 = arith.truncf %340 : vector<2x128xf32> to vector<2x128xbf16>
    %c0_116 = arith.constant 0 : index
    %c0_117 = arith.constant 0 : index
    %342 = vector.load %arg5[%c0_116, %c0_117] : memref<128x128xbf16, #tpu.memory_space<vmem>>, vector<128x128xbf16>
    %cst_118 = arith.constant dense<0.000000e+00> : vector<2x128xf32>
    %343 = tpu.matmul %341, %342, %cst_118 {dimension_numbers = #tpu.dot_dimension_numbers<[1], [0], [0], [1], [0, 0, 1, 1], [], []>} : vector<2x128xbf16>, vector<128x128xbf16>, vector<2x128xf32> -> vector<2x128xf32>
    %c0_119 = arith.constant 0 : index
    %c0_120 = arith.constant 0 : index
    %344 = vector.load %arg6[%c0_119, %c0_120] : memref<1x128xf32, #tpu.memory_space<vmem>>, vector<1x128xf32>
    %345 = vector.broadcast %344 : vector<1x128xf32> to vector<2x128xf32>
    %346 = arith.addf %343, %345 : vector<2x128xf32>
    %c0_121 = arith.constant 0 : index
    %c0_122 = arith.constant 0 : index
    %347 = vector.load %arg7[%c0_121, %c0_122] : memref<2x128xf32, #tpu.memory_space<vmem>>, vector<2x128xf32>
    tpu.vector_store %arg7[%c0_121, %c0_122], %346 {strides = array<i32>} : memref<2x128xf32, #tpu.memory_space<vmem>>, vector<2x128xf32>,
    return
  }
  func.func @transform_0(%arg0: i32, %arg1: memref<2x8xi32, #tpu.memory_space<smem>>) -> (i32, i32) {
    %c0_i32 = arith.constant 0 : i32
    %c0_i32_0 = arith.constant 0 : i32
    %c0_i32_1 = arith.constant 0 : i32
    return %c0_i32, %c0_i32_0 : i32, i32
  }
  func.func @transform_1(%arg0: i32, %arg1: memref<2x8xi32, #tpu.memory_space<smem>>) -> (i32, i32) {
    %c0_i32 = arith.constant 0 : i32
    %c0_i32_0 = arith.constant 0 : i32
    %c0_i32_1 = arith.constant 0 : i32
    return %c0_i32, %c0_i32_0 : i32, i32
  }
  func.func @transform_2(%arg0: i32, %arg1: memref<2x8xi32, #tpu.memory_space<smem>>) -> (i32, i32) {
    %c0_i32 = arith.constant 0 : i32
    %c0_i32_0 = arith.constant 0 : i32
    %c0_i32_1 = arith.constant 0 : i32
    return %c0_i32, %c0_i32_0 : i32, i32
  }
  func.func @transform_3(%arg0: i32, %arg1: memref<2x8xi32, #tpu.memory_space<smem>>) -> (i32, i32) {
    %c0_i32 = arith.constant 0 : i32
    %c0_i32_0 = arith.constant 0 : i32
    %c0_i32_1 = arith.constant 0 : i32
    return %c0_i32, %c0_i32_0 : i32, i32
  }
  func.func @transform_4(%arg0: i32, %arg1: memref<2x8xi32, #tpu.memory_space<smem>>) -> (i32, i32) {
    %c0_i32 = arith.constant 0 : i32
    %c0_i32_0 = arith.constant 0 : i32
    %c0_i32_1 = arith.constant 0 : i32
    return %c0_i32, %c0_i32_0 : i32, i32
  }
  func.func @transform_5(%arg0: i32, %arg1: memref<2x8xi32, #tpu.memory_space<smem>>) -> (i32, i32) {
    %c0_i32 = arith.constant 0 : i32
    %c0_i32_0 = arith.constant 0 : i32
    %c0_i32_1 = arith.constant 0 : i32
    return %c0_i32, %c0_i32_0 : i32, i32
  }
}

</mosaic_0001>

<bundles_post_ra>
// kernel: tpu_custom_call.1
= control target key start
LH: loop header
LB: loop body
LE: loop exit
PB: predicated region body
PF: predicated region fallthrough
CT: control target
= control target key end

     0   :  { %s1938_s24 = smov [#allocation4]   ;;  %s2369_s0 = inlined_call_operand.hbm [shape: s32[2,8], index: 0, kind: input, shape index: {}]   ;;  %s2370_s1 = inlined_call_operand.hbm [shape: f32[24,384], index: 1, kind: input, shape index: {}]   ;;  %s2371_s2 = inlined_call_operand.hbm [shape: bf16[128,384], index: 2, kind: input, shape index: {}]   ;;  %s2372_s3 = inlined_call_operand.vmem [shape: f32[1,128], index: 3, kind: input, shape index: {}]   ;;  %s2373_s4 = inlined_call_operand.hbm [shape: bf16[128,128], index: 4, kind: input, shape index: {}]   ;;  %s2374_s5 = inlined_call_operand.vmem [shape: f32[1,128], index: 5, kind: input, shape index: {}]   ;;  %s2375_s6 = inlined_call_operand.hbm [shape: f32[2,128], index: 6, kind: output, shape index: {}]  }
   0x1   :  { %s12_s23 = sshll.u32 %s2369_s0, 4  ;;  %s13_s23 = int_to_ptr.hbm [resolvable:$true] %s12_s23 }
   0x2   :  { %15 = dma.hbm_to_smem %s13_s23, 32, %s1938_s24, [#allocation3] }
   0x3   :  { %1930 = dma.done.wait [#allocation3], 32 }
   0x4   :  { %1931 = vsyncadd [#allocation3], 4294967264 }
   0x5   :  { %18 = sfence }
   0x6   :  { %19 = vsyncpa [#allocation6], 0 }
   0x7   :  { %20 = vsyncpa [#allocation9], 0  ;;  %s39_s27 = sshll.u32 %s2371_s2, 4  ;;  %s40_s27 = int_to_ptr.hbm [resolvable:$true] %s39_s27 }
   0x8   :  { %21 = vsyncpa [#allocation7], 0  ;;  %s1939_s28 = smov [#allocation8]   ;;  %s26_s0 = sshll.u32 %s2370_s1, 4  ;;  %s27_s0 = int_to_ptr.hbm [resolvable:$true] %s26_s0 }
   0x9   :  { %s41_s29 = sshll.u32 %s1939_s28, 4  ;;  %s1940_s8 = smov 192   ;;  %s42_s29 = int_to_ptr.vmem [resolvable:$true] %s41_s29 }
   0xa   :  { %s1941_s9 = smov 12   ;;  %s1942_s10 = smov [#allocation5]  }
   0xb   :  { %47 = dma.hbm_to_vmem [thread:$0]  %s40_s27, 3072, %s42_s29, [#allocation9], %s1940_s8, %s1940_s8, %s1941_s9  }
   0xc   :  { %s28_s11 = sshll.u32 %s1942_s10, 4  ;;  %s1943_s12 = smov 384   ;;  %s29_s11 = int_to_ptr.vmem [resolvable:$true] %s28_s11 }
   0xd   :  { %s1944_s13 = smov 24   ;;  %s54_s15 = sshll.u32 %s2373_s4, 4  ;;  %s55_s15 = int_to_ptr.hbm [resolvable:$true] %s54_s15 }
   0xe   :  { %34 = dma.hbm_to_vmem [thread:$0]  %s27_s0, 1152, %s29_s11, [#allocation6], %s1943_s12, %s1943_s12, %s1944_s13  }
   0xf   :  { %s1945_s16 = smov [#allocation10]   ;;  %s1946_s18 = smov 64  }
  0x10   :  { %s56_s17 = sshll.u32 %s1945_s16, 4  ;;  %s1947_s1 = smov 4   ;;  %s57_s17 = int_to_ptr.vmem [resolvable:$true] %s56_s17 }
  0x11   :  { %62 = dma.hbm_to_vmem [thread:$0]  %s55_s15, 1024, %s57_s17, [#allocation9], %s1946_s18, %s1946_s18, %s1947_s1  }
  0x12   :  { %1932 = dma.done.wait [#allocation6], 1152  }
  0x13   :  { %1933 = vsyncadd [#allocation6], 4294966144 }
  0x14   :  { %1934 = dma.done.wait [#allocation9], 4096  }
  0x15   :  { %1935 = vsyncadd [#allocation9], 4294963200  ;;  %v1637_v0 = vld [vmem:[#allocation8 + $0xa8] sm:$0xf]  ;;  %v1717_v1 = vld [vmem:[#allocation8 + $0xb0] sm:$0xf0] }
  0x16   :  { %v1716_v2 = vld [vmem:[#allocation8 + $0xac] sm:$0xf]  ;;  %v1997_v3 = vor.u32 %v1717_v1, %v1637_v0  ;;  %v1639_v4 = vld [vmem:[#allocation8 + $0xb4] sm:$0xf0]  ;;  %v1625_v5 = vld [vmem:[#allocation8 + $0x90] sm:$0xf] }
  0x17   :  { %v1714_v6 = vld [vmem:[#allocation8 + $0x98] sm:$0xf0]  ;;  %v1999_v7 = vor.u32 %v1716_v2, %v1639_v4  ;;  %v1713_v8 = vld [vmem:[#allocation8 + $0x94] sm:$0xf]  ;;  %v1627_v9 = vld [vmem:[#allocation8 + $0x9c] sm:$0xf0] }
  0x18   :  { %621 = vmatpush.bf16.msra.mxu0 %v1997_v3  ;;  %v2002_v10 = vor.u32 %v1714_v6, %v1625_v5  ;;  %715 = vmatpush.bf16.msra.mxu3 %v1997_v3  ;;  %v2006_v11 = vor.u32 %v1713_v8, %v1627_v9  ;;  %v1613_v12 = vld [vmem:[#allocation8 + $0x78] sm:$0xf]  ;;  %v1711_v13 = vld [vmem:[#allocation8 + $0x80] sm:$0xf0]  ;;  %v1710_v14 = vld [vmem:[#allocation8 + $0x7c] sm:$0xf] }
  0x19   :  { %634 = vmatpush.bf16.msra.mxu1 %v1999_v7  ;;  %v1615_v15 = vld [vmem:[#allocation8 + $0x84] sm:$0xf0]  ;;  %v1645_v16 = vld [vmem:[#allocation8 + $0xb0] sm:$0xf]  ;;  %v1718_v17 = vld [vmem:[#allocation8 + $0xb8] sm:$0xf0]  ;;  %v2013_v19 = vor.u32 %v1711_v13, %v1613_v12 }
  0x1a   :  { %v2008_v18 = vor.u32 %v1718_v17, %v1645_v16  ;;  %s2010_s4 = sld [smem:[#allocation4]]  ;;  %v1633_v20 = vld [vmem:[#allocation8 + $0x98] sm:$0xf]  ;;  %v1715_v21 = vld [vmem:[#allocation8 + $0xa0] sm:$0xf0]  ;;  %v2019_v22 = vor.u32 %v1710_v14, %v1615_v15  ;;  %vm112_vm0 = vcmask 1040384  }
  0x1b   :  { %s2015_s19 = sld [smem:[#allocation4 + $0x80]]  ;;  %v1601_v23 = vld [vmem:[#allocation8 + $0x60] sm:$0xf]  ;;  %v1708_v24 = vld [vmem:[#allocation8 + $0x68] sm:$0xf0]  ;;  %v2022_v26 = vor.u32 %v1715_v21, %v1633_v20  ;;  %vm121_vm1 = vcmask 1041408  }
  0x1c   :  { %622 = vmatpush.bf16.msra.mxu0 %v2002_v10  ;;  %716 = vmatpush.bf16.msra.mxu3 %v2002_v10  ;;  %v1707_v25 = vld [vmem:[#allocation8 + $0x64] sm:$0xf]  ;;  %v1603_v27 = vld [vmem:[#allocation8 + $0x6c] sm:$0xf0]  ;;  %v1621_v28 = vld [vmem:[#allocation8 + $0x80] sm:$0xf]  ;;  %v2025_v30 = vor.u32 %v1708_v24, %v1601_v23 }
  0x1d   :  { %635 = vmatpush.bf16.msra.mxu1 %v2006_v11  ;;  %647 = vmatpush.bf16.msra.mxu2 %v2008_v18  ;;  %v1712_v29 = vld [vmem:[#allocation8 + $0x88] sm:$0xf0]  ;;  %v2029_v31 = vor.u32 %v1707_v25, %v1603_v27  ;;  %v1589_v32 = vld [vmem:[#allocation8 + $0x48] sm:$0xf]  ;;  %v1705_v33 = vld [vmem:[#allocation8 + $0x50] sm:$0xf0] }
  0x1e   :  { %v1704_v34 = vld [vmem:[#allocation8 + $0x4c] sm:$0xf]  ;;  %v2032_v35 = vor.u32 %v1712_v29, %v1621_v28  ;;  %v1591_v36 = vld [vmem:[#allocation8 + $0x54] sm:$0xf0]  ;;  %v1609_v37 = vld [vmem:[#allocation8 + $0x68] sm:$0xf]  ;;  %v2036_v39 = vor.u32 %v1705_v33, %v1589_v32 }
  0x1f   :  { %v1709_v38 = vld [vmem:[#allocation8 + $0x70] sm:$0xf0]  ;;  %v1577_v40 = vld [vmem:[#allocation8 + $0x30] sm:$0xf]  ;;  %v1702_v41 = vld [vmem:[#allocation8 + $0x38] sm:$0xf0]  ;;  %v2040_v43 = vor.u32 %v1704_v34, %v1591_v36 }
  0x20   :  { %623 = vmatpush.bf16.msra.mxu0 %v2013_v19  ;;  %717 = vmatpush.bf16.msra.mxu3 %v2013_v19  ;;  %s79_s20 = sshra.s32 %s2010_s4, 3  ;;  %v1701_v42 = vld [vmem:[#allocation8 + $0x34] sm:$0xf]  ;;  %v1579_v44 = vld [vmem:[#allocation8 + $0x3c] sm:$0xf0]  ;;  %v2043_v45 = vor.u32 %v1709_v38, %v1609_v37  ;;  %s82_s21 = sand.u32 7, %s2010_s4  ;;  %v2049_v50 = vor.u32 %v1702_v41, %v1577_v40 }
  0x21   :  { %636 = vmatpush.bf16.msra.mxu1 %v2019_v22  ;;  %648 = vmatpush.bf16.msra.mxu2 %v2022_v26  ;;  %v1597_v46 = vld [vmem:[#allocation8 + $0x50] sm:$0xf]  ;;  %s1520_s22 = smul.u32 24, %s79_s20  ;;  %v1706_v47 = vld [vmem:[#allocation8 + $0x58] sm:$0xf0]  ;;  %s89_s23 = sshra.s32 %s2015_s19, 3  ;;  %v2053_v53 = vor.u32 %v1701_v42, %v1579_v44 }
  0x22   :  { %s92_s24 = sand.u32 7, %s2015_s19  ;;  %v1565_v48 = vld [vmem:[#allocation8 + $0x18] sm:$0xf]  ;;  %v1699_v49 = vld [vmem:[#allocation8 + $0x20] sm:$0xf0]  ;;  %s1522_s26 = smul.u32 24, %s89_s23  ;;  %v2056_v54 = vor.u32 %v1706_v47, %v1597_v46 }
  0x23   :  { %s85_s25 = sadd.s32 %s1520_s22, %s82_s21  ;;  %v1698_v51 = vld [vmem:[#allocation8 + $0x1c] sm:$0xf]  ;;  %v1567_v52 = vld [vmem:[#allocation8 + $0x24] sm:$0xf0]  ;;  %v1585_v55 = vld [vmem:[#allocation8 + $0x38] sm:$0xf]  ;;  %v2059_v62 = vor.u32 %v1699_v49, %v1565_v48 }
  0x24   :  { %624 = vmatpush.bf16.msra.mxu0 %v2025_v30  ;;  %718 = vmatpush.bf16.msra.mxu3 %v2025_v30  ;;  %s86_s27 = scalar_lea.vmem [#allocation5], %s85_s25  ;;  %s95_s28 = sadd.s32 %s1522_s26, %s92_s24  ;;  %v1703_v57 = vld [vmem:[#allocation8 + $0x40] sm:$0xf0]  ;;  %v1553_v63 = vld [vmem:[#allocation8] sm:$0xf]  ;;  %v2063_v4 = vor.u32 %v1698_v51, %v1567_v52  ;;  %vm123_vm2 = vcmask 1043456  }
  0x25   :  { %637 = vmatpush.bf16.msra.mxu1 %v2029_v31  ;;  %649 = vmatpush.bf16.msra.mxu2 %v2032_v35  ;;  %v87_v56 = vld [vmem:[%s86_s27] ss:$8 sm:$0x7]  ;;  %s96_s29 = scalar_lea.vmem [#allocation5], %s95_s28  ;;  %v1696_v5 = vld [vmem:[#allocation8 + $0x8] sm:$0xf0]  ;;  %v2066_v9 = vor.u32 %v1703_v57, %v1585_v55 }
  0x26   :  { %v99_v58 = vperm.slane %v87_v56, 0  ;;  %v100_v59 = vperm.slane %v87_v56, 1  ;;  %v101_v60 = vperm.slane %v87_v56, 2  ;;  %v97_v61 = vld [vmem:[%s96_s29] ss:$8 sm:$0x7]  ;;  %v2072_v21 = vor.u32 %v1696_v5, %v1553_v63 }
  0x27   :  { %v106_v0 = vperm.slane %v97_v61, 0  ;;  %v107_v1 = vperm.slane %v97_v61, 1  ;;  %v108_v2 = vperm.slane %v97_v61, 2  ;;  %v1695_v6 = vld [vmem:[#allocation8 + $0x4] sm:$0xf]  ;;  %v1948_v33 = vmov 0  }
  0x28   :  { %625 = vmatpush.bf16.msra.mxu0 %v2036_v39  ;;  %719 = vmatpush.bf16.msra.mxu3 %v2036_v39  ;;  %v1555_v8 = vld [vmem:[#allocation8 + $0xc] sm:$0xf0]  ;;  %v1573_v12 = vld [vmem:[#allocation8 + $0x20] sm:$0xf]  ;;  %v1700_v13 = vld [vmem:[#allocation8 + $0x28] sm:$0xf0] }
  0x29   :  { %638 = vmatpush.bf16.msra.mxu1 %v2040_v43  ;;  %650 = vmatpush.bf16.msra.mxu2 %v2043_v45  ;;  %v113_v14 = vsel %vm112_vm0, %v99_v58, %v106_v0  ;;  %v114_v15 = vsel %vm112_vm0, %v100_v59, %v107_v1  ;;  %v115_v16 = vsel %vm112_vm0, %v101_v60, %v108_v2  ;;  %v1561_v27 = vld [vmem:[#allocation8 + $0x8] sm:$0xf]  ;;  %v1697_v28 = vld [vmem:[#allocation8 + $0x10] sm:$0xf0]  ;;  %s1523_s30 = sld [smem:[#allocation4 + $0x1]] }
  0x2a   :  { %v119_v17 = vrot.slane %v114_v15, 6  ;;  %v120_v20 = vrot.slane %v115_v16, 4  ;;  %v2076_v23 = vor.u32 %v1695_v6, %v1555_v8  ;;  %v2079_v24 = vor.u32 %v1700_v13, %v1573_v12  ;;  %s1525_s7 = sld [smem:[#allocation4 + $0x81]]  ;;  %v2156_v16 = vld [vmem:[%s2372_s3] ss:$0 sm:$0xff] }
  0x2b   :  { %v2087_v32 = vor.u32 %v1697_v28, %v1561_v27  ;;  %s1527_s18 = sld [smem:[#allocation4 + $0x2]] }
  0x2c   :  { %626 = vmatpush.bf16.msra.mxu0 %v2049_v50  ;;  %720 = vmatpush.bf16.msra.mxu3 %v2049_v50  ;;  %v122_v25 = vsel %vm121_vm1, %v113_v14, %v119_v17  ;;  %s1529_s1 = sld [smem:[#allocation4 + $0x82]] }
  0x2d   :  { %639 = vmatpush.bf16.msra.mxu1 %v2053_v53  ;;  %651 = vmatpush.bf16.msra.mxu2 %v2056_v54  ;;  %v124_v29 = vsel %vm123_vm2, %v122_v25, %v120_v20  ;;  %s1531_s28 = sld [smem:[#allocation4 + $0x3]] }
  0x2e   :  { %126 = vst [vmem:[#allocation2] sm:$0x3f] %v124_v29  ;;  %s1533_s29 = sld [smem:[#allocation4 + $0x83]] }
  0x2f   :  { %s128_s0 = sshra.s32 %s1523_s30, 3  ;;  %s131_s10 = sand.u32 7, %s1523_s30 }
  0x30   :  { %627 = vmatpush.bf16.msra.mxu0 %v2059_v62  ;;  %721 = vmatpush.bf16.msra.mxu3 %v2059_v62  ;;  %s138_s8 = sshra.s32 %s1525_s7, 3  ;;  %s1524_s9 = smul.u32 24, %s128_s0 }
  0x31   :  { %640 = vmatpush.bf16.msra.mxu1 %v2063_v4  ;;  %652 = vmatpush.bf16.msra.mxu2 %v2066_v9  ;;  %s1526_s11 = smul.u32 24, %s138_s8  ;;  %s141_s12 = sand.u32 7, %s1525_s7 }
  0x32   :  { %s134_s13 = sadd.s32 %s1524_s9, %s131_s10  ;;  %s175_s4 = sshra.s32 %s1527_s18, 3 }
  0x33   :  { %s144_s2 = sadd.s32 %s1526_s11, %s141_s12  ;;  %s135_s14 = scalar_lea.vmem [#allocation5], %s134_s13 }
  0x34   :  { %628 = vmatpush.bf16.msra.mxu0 %v2072_v21  ;;  %722 = vmatpush.bf16.msra.mxu3 %v2072_v21  ;;  %v136_v56 = vld [vmem:[%s135_s14] ss:$8 sm:$0x7]  ;;  %s145_s15 = scalar_lea.vmem [#allocation5], %s144_s2  ;;  %s185_s19 = sshra.s32 %s1529_s1, 3 }
  0x35   :  { %641 = vmatpush.bf16.msra.mxu1 %v2076_v23  ;;  %653 = vmatpush.bf16.msra.mxu2 %v2079_v24  ;;  %v2146_v34 = vld [vmem:[#allocation2] sm:$0x3f]  ;;  %v148_v58 = vperm.slane %v136_v56, 0  ;;  %v149_v59 = vperm.slane %v136_v56, 1  ;;  %v150_v60 = vperm.slane %v136_v56, 2  ;;  %s1528_s20 = smul.u32 24, %s175_s4 }
  0x36   :  { %v681_v36 = vrot.slane %v2146_v34, 2  ;;  %v146_v57 = vld [vmem:[%s145_s15] ss:$8 sm:$0x7]  ;;  %s1530_s21 = smul.u32 24, %s185_s19  ;;  %s178_s22 = sand.u32 7, %s1527_s18 }
  0x37   :  { %629 = vmatmul.bf16.vlgmr.msra.gmra.mxu0 %v1948_v33  ;;  %v155_v63 = vperm.slane %v146_v57, 0  ;;  %v156_v0 = vperm.slane %v146_v57, 1  ;;  %v157_v1 = vperm.slane %v146_v57, 2  ;;  %s188_s23 = sand.u32 7, %s1529_s1  ;;  %s181_s24 = sadd.s32 %s1528_s20, %s178_s22 }
  0x38   :  { %728 = vmatpush.bf16.msrb.mxu0 %v1999_v7  ;;  %822 = vmatpush.bf16.msrb.mxu3 %v1999_v7  ;;  %s191_s25 = sadd.s32 %s1530_s21, %s188_s23  ;;  %s182_s26 = scalar_lea.vmem [#allocation5], %s181_s24 }
  0x39   :  { %741 = vmatpush.bf16.msrb.mxu1 %v2008_v18  ;;  %654 = vmatpush.bf16.msra.mxu2 %v2087_v32  ;;  %v161_v8 = vsel %vm112_vm0, %v148_v58, %v155_v63  ;;  %v162_v12 = vsel %vm112_vm0, %v149_v59, %v156_v0  ;;  %v163_v14 = vsel %vm112_vm0, %v150_v60, %v157_v1  ;;  %s192_s27 = scalar_lea.vmem [#allocation5], %s191_s25  ;;  %s222_s30 = sshra.s32 %s1531_s28, 3 }
  0x3a   :  { %642 = vmatmul.bf16.vlgmr.msra.gmra.mxu1 %v1948_v33  ;;  %v167_v15 = vrot.slane %v162_v12, 6  ;;  %v168_v20 = vrot.slane %v163_v14, 4  ;;  %s232_s7 = sshra.s32 %s1533_s29, 3  ;;  %s1532_s0 = smul.u32 24, %s222_s30 }
  0x3b   :  { %s225_s8 = sand.u32 7, %s1531_s28  ;;  %s1534_s9 = smul.u32 24, %s232_s7 }
  0x3c   :  { %729 = vmatpush.bf16.msrb.mxu0 %v2006_v11  ;;  %823 = vmatpush.bf16.msrb.mxu3 %v2006_v11  ;;  %v169_v28 = vsel %vm121_vm1, %v161_v8, %v167_v15  ;;  %s235_s10 = sand.u32 7, %s1533_s29  ;;  %s228_s11 = sadd.s32 %s1532_s0, %s225_s8 }
  0x3d   :  { %742 = vmatpush.bf16.msrb.mxu1 %v2022_v26  ;;  %809 = vmatpush.bf16.msrb.mxu2 %v1997_v3  ;;  %s238_s12 = sadd.s32 %s1534_s9, %s235_s10  ;;  %s229_s13 = scalar_lea.vmem [#allocation5], %s228_s11 }
  0x3e   :  { %655 = vmatmul.bf16.vlgmr.msra.gmra.mxu2 %v1948_v33  ;;  %s239_s2 = scalar_lea.vmem [#allocation5], %s238_s12  ;;  %s1535_s14 = sld [smem:[#allocation4 + $0x4]] }
  0x3f   :  { %s1537_s15 = sld [smem:[#allocation4 + $0x84]] }
  0x40   :  { %730 = vmatpush.bf16.msrb.mxu0 %v2019_v22  ;;  %824 = vmatpush.bf16.msrb.mxu3 %v2019_v22  ;;  %s1539_s24 = sld [smem:[#allocation4 + $0x5]] }
  0x41   :  { %743 = vmatpush.bf16.msrb.mxu1 %v2032_v35  ;;  %810 = vmatpush.bf16.msrb.mxu2 %v2002_v10  ;;  %s1541_s25 = sld [smem:[#allocation4 + $0x85]] }
  0x44   :  { %731 = vmatpush.bf16.msrb.mxu0 %v2029_v31  ;;  %825 = vmatpush.bf16.msrb.mxu3 %v2029_v31  ;;  %s269_s16 = sshra.s32 %s1535_s14, 3  ;;  %s272_s4 = sand.u32 7, %s1535_s14 }
  0x45   :  { %744 = vmatpush.bf16.msrb.mxu1 %v2043_v45  ;;  %811 = vmatpush.bf16.msrb.mxu2 %v2013_v19  ;;  %s279_s17 = sshra.s32 %s1537_s15, 3  ;;  %s1536_s18 = smul.u32 24, %s269_s16 }
  0x46   :  { %s1538_s1 = smul.u32 24, %s279_s17  ;;  %s282_s19 = sand.u32 7, %s1537_s15 }
  0x47   :  { %s275_s20 = sadd.s32 %s1536_s18, %s272_s4  ;;  %s319_s29 = sand.u32 7, %s1539_s24 }
  0x48   :  { %732 = vmatpush.bf16.msrb.mxu0 %v2040_v43  ;;  %826 = vmatpush.bf16.msrb.mxu3 %v2040_v43  ;;  %s285_s21 = sadd.s32 %s1538_s1, %s282_s19  ;;  %s276_s22 = scalar_lea.vmem [#allocation5], %s275_s20 }
  0x49   :  { %745 = vmatpush.bf16.msrb.mxu1 %v2056_v54  ;;  %812 = vmatpush.bf16.msrb.mxu2 %v2025_v30  ;;  %s286_s23 = scalar_lea.vmem [#allocation5], %s285_s21  ;;  %s329_s7 = sand.u32 7, %s1541_s25 }
  0x4a   :  { %s1547_s21 = sld [smem:[#allocation4 + $0x7]] }
  0x4c   :  { %733 = vmatpush.bf16.msrb.mxu0 %v2053_v53  ;;  %827 = vmatpush.bf16.msrb.mxu3 %v2053_v53 }
  0x4d   :  { %746 = vmatpush.bf16.msrb.mxu1 %v2066_v9  ;;  %813 = vmatpush.bf16.msrb.mxu2 %v2036_v39 }
  0x50   :  { %734 = vmatpush.bf16.msrb.mxu0 %v2063_v4  ;;  %828 = vmatpush.bf16.msrb.mxu3 %v2063_v4 }
  0x51   :  { %747 = vmatpush.bf16.msrb.mxu1 %v2079_v24  ;;  %814 = vmatpush.bf16.msrb.mxu2 %v2049_v50 }
  0x54   :  { %735 = vmatpush.bf16.msrb.mxu0 %v2076_v23  ;;  %829 = vmatpush.bf16.msrb.mxu3 %v2076_v23 }
  0x55   :  { %748 = vmatpush.bf16.msrb.mxu1 %v2087_v32  ;;  %815 = vmatpush.bf16.msrb.mxu2 %v2059_v62 }
  0x58   :  { %835 = vmatpush.bf16.msra.mxu0 %v2008_v18 }
  0x59   :  { %903 = vmatpush.bf16.msra.mxu1 %v1997_v3  ;;  %816 = vmatpush.bf16.msrb.mxu2 %v2072_v21 }
  0x5c   :  { %836 = vmatpush.bf16.msra.mxu0 %v2022_v26 }
  0x5d   :  { %916 = vmatpush.bf16.msra.mxu2 %v1999_v7  ;;  %904 = vmatpush.bf16.msra.mxu1 %v2002_v10 }
  0x60   :  { %837 = vmatpush.bf16.msra.mxu0 %v2032_v35 }
  0x61   :  { %917 = vmatpush.bf16.msra.mxu2 %v2006_v11  ;;  %905 = vmatpush.bf16.msra.mxu1 %v2013_v19 }
  0x64   :  { %838 = vmatpush.bf16.msra.mxu0 %v2043_v45 }
  0x65   :  { %918 = vmatpush.bf16.msra.mxu2 %v2019_v22  ;;  %906 = vmatpush.bf16.msra.mxu1 %v2025_v30 }
  0x68   :  { %839 = vmatpush.bf16.msra.mxu0 %v2056_v54 }
  0x69   :  { %919 = vmatpush.bf16.msra.mxu2 %v2029_v31  ;;  %907 = vmatpush.bf16.msra.mxu1 %v2036_v39 }
  0x6c   :  { %840 = vmatpush.bf16.msra.mxu0 %v2066_v9 }
  0x6d   :  { %920 = vmatpush.bf16.msra.mxu2 %v2040_v43  ;;  %908 = vmatpush.bf16.msra.mxu1 %v2049_v50 }
  0x70   :  { %841 = vmatpush.bf16.msra.mxu0 %v2079_v24 }
  0x71   :  { %921 = vmatpush.bf16.msra.mxu2 %v2053_v53  ;;  %909 = vmatpush.bf16.msra.mxu1 %v2059_v62 }
  0x74   :  { %842 = vmatpush.bf16.msra.mxu0 %v2087_v32 }
  0x75   :  { %922 = vmatpush.bf16.msra.mxu2 %v2063_v4  ;;  %910 = vmatpush.bf16.msra.mxu1 %v2072_v21 }
  0x79   :  { %923 = vmatpush.bf16.msra.mxu2 %v2076_v23 }
  0xb4   :  { %v630_v37 = vpop.f32.mrf.mxu0 }
  0xb5   :  { %v660_v38 = vadd.f32 %v630_v37, %v2146_v34 }
  0xb7   :  { %v643_v40 = vpop.f32.mrf.mxu1  ;;  %v1647_v42 = vmul.f32 -1.442695, %v660_v38 }
  0xb8   :  { %v683_v41 = vadd.f32 %v681_v36, %v643_v40  ;;  %v170_v36 = vsel %vm123_vm2, %v169_v28, %v168_v20 }
  0xb9   :  { %1741 = vpow2.f32 %v1647_v42  ;;  %173 = vst [vmem:[#allocation2 + $0x6] sm:$0x3f] %v170_v36  ;;  %v705_v42 = vrot.slane %v2146_v34, 4 }
  0xba   :  { %v1648_v44 = vmul.f32 -1.442695, %v683_v41 }
  0xbc   :  { %1743 = vpow2.f32 %v1648_v44  ;;  %v632_v46 = vpop.f32.mrf.mxu0 }
  0xbf   :  { %v645_v47 = vpop.f32.mrf.mxu1  ;;  %v1742_v48 = vpop.eup %1741 }
  0xc0   :  { %v664_v52 = vadd.f32 1.0, %v1742_v48 }
  0xc1   :  { %v656_v49 = vpop.f32.mrf.mxu2 }
  0xc2   :  { %v1744_v51 = vpop.eup %1743  ;;  %1745 = vrcp.f32 %v664_v52  ;;  %v676_v27 = vand.u32 2147483648, %v664_v52  ;;  %v674_v33 = vand.u32 2147483647, %v664_v52  ;;  %vm670_vm4 = vweird.f32 %v664_v52 }
  0xc3   :  { %v687_v55 = vadd.f32 1.0, %v1744_v51  ;;  %v703_v40 = vadd.f32 %v2156_v16, %v656_v49 }
  0xc4   :  { %v677_v41 = vor.u32 1.1754944e-38, %v676_v27  ;;  %vm675_vm6 = vcmp.eq.f32.partialorder %v674_v33, 8.507059e+37 }
  0xc5   :  { %1747 = vrcp.f32 %v687_v55  ;;  %vm693_vm7 = vweird.f32 %v687_v55  ;;  %v699_v51 = vand.u32 2147483648, %v687_v55  ;;  %v697_v56 = vand.u32 2147483647, %v687_v55 }
  0xc7   :  { %vm698_vm10 = vcmp.eq.f32.partialorder %v697_v56, 8.507059e+37 }
  0xc8   :  { %v1746_v2 = vpop.eup %1745 }
  0xc9   :  { %v658_v61 = vpop.f32.mrf.mxu2  ;;  %v666_v6 = vmul.f32 %v1746_v2, %v664_v52  ;;  %vm671_vm3 = vweird.f32 %v1746_v2  ;;  %v700_v52 = vor.u32 1.1754944e-38, %v699_v51 }
  0xca   :  { %vm672_vm5 = vmor %vm670_vm4, %vm671_vm3 }
  0xcb   :  { %v1748_v5 = vpop.eup %1747  ;;  %v667_v17 = vsub.f32 1.0, %v666_v6 }
  0xcc   :  { %v689_v13 = vmul.f32 %v1748_v5, %v687_v55  ;;  %vm694_vm8 = vweird.f32 %v1748_v5  ;;  %v713_v55 = vld [vmem:[#allocation2 + $0x6] sm:$0x3f] }
  0xcd   :  { %v668_v29 = vmul.f32 %v1746_v2, %v667_v17  ;;  %vm695_vm9 = vmor %vm693_vm7, %vm694_vm8  ;;  %v775_v1 = vrot.slane %v713_v55, 2  ;;  %v799_v56 = vrot.slane %v713_v55, 4 }
  0xce   :  { %v690_v25 = vsub.f32 1.0, %v689_v13 }
  0xcf   :  { %v669_v38 = vadd.f32 %v1746_v2, %v668_v29 }
  0xd0   :  { %v691_v37 = vmul.f32 %v1748_v5, %v690_v25 }
  0xd1   :  { %v673_v44 = vsel %vm672_vm5, %v1746_v2, %v669_v38 }
  0xd2   :  { %v678_v46 = vsel %vm675_vm6, %v677_v41, %v673_v44  ;;  %v692_v47 = vadd.f32 %v1748_v5, %v691_v37 }
  0xd3   :  { %v704_v48 = vmul.f32 %v703_v40, %v678_v46 }
  0xd4   :  { %v696_v58 = vsel %vm695_vm9, %v1748_v5, %v692_v47 }
  0xd5   :  { %v707_v57 = vadd.f32 %v705_v42, %v704_v48  ;;  %v701_v49 = vsel %vm698_vm10, %v700_v52, %v696_v58 }
  0xd6   :  { %v709_v59 = vsub.f32 1.0, %v701_v49  ;;  %v711_v34 = vmul.f32 0.0, %v701_v49 }
  0xd7   :  { %1749 = vtanh.f32 %v707_v57 }
  0xdd   :  { %v1750_v60 = vpop.eup %1749 }
  0xde   :  { %v710_v61 = vmul.f32 %v1750_v60, %v709_v59 }
  0xe0   :  { %v2162_v63 = vadd.f32 %v711_v34, %v710_v61 }
  0xe2   :  { %v714_v0 = vpack.c.bf16 %v2162_v63, %v2162_v63 }
  0xe4   :  { %723 = vmatmul.bf16.vlgmr.msra.gmra.mxu3 %v714_v0  ;;  %736 = vmatmul.bf16.vlgmr.msrb.gmra.mxu0 %v714_v0 }
  0xe5   :  { %749 = vmatmul.bf16.vlgmr.msrb.gmra.mxu1 %v714_v0  ;;  %929 = vmatpush.bf16.msra.mxu3 %v2008_v18 }
  0xe6   :  { %997 = vmatpush.bf16.msrb.mxu0 %v1997_v3  ;;  %1010 = vmatpush.bf16.msrb.mxu1 %v1999_v7 }
  0xe9   :  { %930 = vmatpush.bf16.msra.mxu3 %v2022_v26 }
  0xea   :  { %998 = vmatpush.bf16.msrb.mxu0 %v2002_v10  ;;  %1011 = vmatpush.bf16.msrb.mxu1 %v2006_v11 }
  0xed   :  { %931 = vmatpush.bf16.msra.mxu3 %v2032_v35 }
  0xee   :  { %999 = vmatpush.bf16.msrb.mxu0 %v2013_v19  ;;  %1012 = vmatpush.bf16.msrb.mxu1 %v2019_v22 }
  0xf1   :  { %932 = vmatpush.bf16.msra.mxu3 %v2043_v45 }
  0xf2   :  { %1000 = vmatpush.bf16.msrb.mxu0 %v2025_v30  ;;  %1013 = vmatpush.bf16.msrb.mxu1 %v2029_v31 }
  0xf5   :  { %933 = vmatpush.bf16.msra.mxu3 %v2056_v54 }
  0xf6   :  { %1001 = vmatpush.bf16.msrb.mxu0 %v2036_v39  ;;  %1014 = vmatpush.bf16.msrb.mxu1 %v2040_v43 }
  0xf9   :  { %934 = vmatpush.bf16.msra.mxu3 %v2066_v9 }
  0xfa   :  { %1002 = vmatpush.bf16.msrb.mxu0 %v2049_v50  ;;  %1015 = vmatpush.bf16.msrb.mxu1 %v2053_v53 }
  0xfd   :  { %935 = vmatpush.bf16.msra.mxu3 %v2079_v24 }
  0xfe   :  { %1003 = vmatpush.bf16.msrb.mxu0 %v2059_v62  ;;  %1016 = vmatpush.bf16.msrb.mxu1 %v2063_v4 }
 0x101   :  { %936 = vmatpush.bf16.msra.mxu3 %v2087_v32 }
 0x102   :  { %1004 = vmatpush.bf16.msrb.mxu0 %v2072_v21  ;;  %1017 = vmatpush.bf16.msrb.mxu1 %v2076_v23 }
 0x161   :  { %v737_v2 = vpop.f32.mrf.mxu0 }
 0x162   :  { %v777_v5 = vadd.f32 %v775_v1, %v737_v2  ;;  %v750_v6 = vpop.f32.mrf.mxu1 }
 0x163   :  { %v797_v57 = vadd.f32 %v2156_v16, %v750_v6 }
 0x164   :  { %v1650_v8 = vmul.f32 -1.442695, %v777_v5 }
 0x166   :  { %1751 = vpow2.f32 %v1650_v8 }
 0x167   :  { %v724_v12 = vpop.f32.mrf.mxu3 }
 0x168   :  { %v754_v13 = vadd.f32 %v724_v12, %v713_v55 }
 0x169   :  { %v739_v14 = vpop.f32.mrf.mxu0 }
 0x16a   :  { %v1649_v15 = vmul.f32 -1.442695, %v754_v13  ;;  %v752_v17 = vpop.f32.mrf.mxu1  ;;  %v193_v14 = vld [vmem:[%s192_s27] ss:$8 sm:$0x7]  ;;  %s326_s27 = sshra.s32 %s1541_s25, 3 }
 0x16b   :  { %v203_v17 = vperm.slane %v193_v14, 1  ;;  %s1542_s30 = smul.u32 24, %s326_s27 }
 0x16c   :  { %v1752_v20 = vpop.eup %1751  ;;  %1753 = vpow2.f32 %v1649_v15 }
 0x16d   :  { %v781_v25 = vadd.f32 1.0, %v1752_v20  ;;  %s332_s8 = sadd.s32 %s1542_s30, %s329_s7 }
 0x16e   :  { %s333_s10 = scalar_lea.vmem [#allocation5], %s332_s8 }
 0x16f   :  { %v726_v27 = vpop.f32.mrf.mxu3  ;;  %1755 = vrcp.f32 %v781_v25  ;;  %v793_v59 = vand.u32 2147483648, %v781_v25  ;;  %vm787_vm3 = vweird.f32 %v781_v25  ;;  %v791_v61 = vand.u32 2147483647, %v781_v25 }
 0x171   :  { %v794_v1 = vor.u32 1.1754944e-38, %v793_v59  ;;  %vm792_vm5 = vcmp.eq.f32.partialorder %v791_v61, 8.507059e+37 }
 0x172   :  { %v1754_v28 = vpop.eup %1753 }
 0x173   :  { %v758_v29 = vadd.f32 1.0, %v1754_v28  ;;  %v202_v28 = vperm.slane %v193_v14, 0 }
 0x175   :  { %1757 = vrcp.f32 %v758_v29  ;;  %v1756_v33 = vpop.eup %1755  ;;  %v770_v42 = vand.u32 2147483648, %v758_v29  ;;  %v768_v46 = vand.u32 2147483647, %v758_v29  ;;  %vm764_vm12 = vweird.f32 %v758_v29 }
 0x176   :  { %v783_v36 = vmul.f32 %v1756_v33, %v781_v25  ;;  %vm788_vm15 = vweird.f32 %v1756_v33  ;;  %v204_v25 = vperm.slane %v193_v14, 2 }
 0x177   :  { %v771_v51 = vor.u32 1.1754944e-38, %v770_v42  ;;  %vm769_vm14 = vcmp.eq.f32.partialorder %v768_v46, 8.507059e+37  ;;  %vm789_vm4 = vmor %vm787_vm3, %vm788_vm15 }
 0x178   :  { %v784_v40 = vsub.f32 1.0, %v783_v36 }
 0x17a   :  { %v785_v47 = vmul.f32 %v1756_v33, %v784_v40 }
 0x17b   :  { %v1758_v37 = vpop.eup %1757 }
 0x17c   :  { %v760_v38 = vmul.f32 %v1758_v37, %v758_v29  ;;  %vm765_vm11 = vweird.f32 %v1758_v37  ;;  %v786_v49 = vadd.f32 %v1756_v33, %v785_v47 }
 0x17d   :  { %vm766_vm13 = vmor %vm764_vm12, %vm765_vm11 }
 0x17e   :  { %v761_v41 = vsub.f32 1.0, %v760_v38  ;;  %v790_v0 = vsel %vm789_vm4, %v1756_v33, %v786_v49 }
 0x17f   :  { %v795_v2 = vsel %vm792_vm5, %v794_v1, %v790_v0  ;;  %v230_v1 = vld [vmem:[%s229_s13] ss:$8 sm:$0x7]  ;;  %s1545_s13 = sld [smem:[#allocation4 + $0x86]] }
 0x180   :  { %v762_v44 = vmul.f32 %v1758_v37, %v761_v41  ;;  %v803_v5 = vsub.f32 1.0, %v795_v2  ;;  %v805_v6 = vmul.f32 %v795_v2, %v2162_v63  ;;  %v183_v63 = vld [vmem:[%s182_s26] ss:$8 sm:$0x7]  ;;  %s316_s26 = sshra.s32 %s1539_s24, 3 }
 0x181   :  { %v196_v15 = vperm.slane %v183_v63, 1  ;;  %v197_v20 = vperm.slane %v183_v63, 2  ;;  %v195_v27 = vperm.slane %v183_v63, 0  ;;  %v240_v2 = vld [vmem:[%s239_s2] ss:$8 sm:$0x7] }
 0x182   :  { %v763_v48 = vadd.f32 %v1758_v37, %v762_v44  ;;  %v251_v63 = vperm.slane %v240_v2, 2  ;;  %s1540_s28 = smul.u32 24, %s316_s26  ;;  %s413_s26 = sand.u32 7, %s1547_s21 }
 0x183   :  { %v209_v29 = vsel %vm112_vm0, %v196_v15, %v203_v17  ;;  %v210_v33 = vsel %vm112_vm0, %v197_v20, %v204_v25 }
 0x184   :  { %v767_v58 = vsel %vm766_vm13, %v1758_v37, %v763_v48  ;;  %v214_v36 = vrot.slane %v209_v29, 6  ;;  %v208_v37 = vsel %vm112_vm0, %v195_v27, %v202_v28  ;;  %v215_v38 = vrot.slane %v210_v33, 4  ;;  %s322_s0 = sadd.s32 %s1540_s28, %s319_s29 }
 0x185   :  { %v772_v52 = vsel %vm769_vm14, %v771_v51, %v767_v58  ;;  %s323_s9 = scalar_lea.vmem [#allocation5], %s322_s0  ;;  %s373_s14 = sshra.s32 %s1545_s13, 3 }
 0x186   :  { %v798_v60 = vmul.f32 %v797_v57, %v772_v52  ;;  %v216_v40 = vsel %vm121_vm1, %v208_v37, %v214_v36  ;;  %s1546_s16 = smul.u32 24, %s373_s14  ;;  %s376_s18 = sand.u32 7, %s1545_s13 }
 0x187   :  { %v217_v41 = vsel %vm123_vm2, %v216_v40, %v215_v38  ;;  %s1461_s13 = sshll.u32 %s2375_s6, 4  ;;  %s1462_s13 = int_to_ptr.hbm [resolvable:$true] %s1461_s13 }
 0x188   :  { %v801_v34 = vadd.f32 %v799_v56, %v798_v60  ;;  %220 = vst [vmem:[#allocation2 + $0xc] sm:$0x3f] %v217_v41  ;;  %s379_s4 = sadd.s32 %s1546_s16, %s376_s18 }
 0x189   :  { %s380_s20 = scalar_lea.vmem [#allocation5], %s379_s4 }
 0x18a   :  { %1759 = vtanh.f32 %v801_v34 }
 0x18f   :  { %v2225_v42 = vld [vmem:[#allocation2 + $0xc] sm:$0x3f] }
 0x190   :  { %v1760_v55 = vpop.eup %1759  ;;  %v869_v46 = vrot.slane %v2225_v42, 2 }
 0x191   :  { %v804_v8 = vmul.f32 %v1760_v55, %v803_v5  ;;  %v242_v5 = vperm.slane %v230_v1, 0  ;;  %v243_v55 = vperm.slane %v230_v1, 1 }
 0x193   :  { %v2192_v12 = vadd.f32 %v805_v6, %v804_v8  ;;  %v244_v8 = vperm.slane %v230_v1, 2  ;;  %v249_v6 = vperm.slane %v240_v2, 0 }
 0x195   :  { %v808_v13 = vpack.c.bf16 %v2192_v12, %v2192_v12  ;;  %v255_v20 = vsel %vm112_vm0, %v242_v5, %v249_v6  ;;  %v257_v28 = vsel %vm112_vm0, %v244_v8, %v251_v63 }
 0x196   :  { %v262_v36 = vrot.slane %v257_v28, 4 }
 0x197   :  { %817 = vmatmul.bf16.vlgmr.msrb.gmra.mxu2 %v808_v13  ;;  %830 = vmatmul.bf16.vlgmr.msrb.gmra.mxu3 %v808_v13 }
 0x198   :  { %843 = vmatmul.bf16.vlgmr.msra.gmra.mxu0 %v808_v13  ;;  %1023 = vmatpush.bf16.msrb.mxu2 %v2008_v18  ;;  %v250_v13 = vperm.slane %v240_v2, 1 }
 0x199   :  { %1091 = vmatpush.bf16.msrb.mxu3 %v1997_v3  ;;  %1104 = vmatpush.bf16.msra.mxu0 %v1999_v7 }
 0x19a   :  { %v256_v25 = vsel %vm112_vm0, %v243_v55, %v250_v13 }
 0x19b   :  { %v261_v29 = vrot.slane %v256_v25, 6 }
 0x19c   :  { %1024 = vmatpush.bf16.msrb.mxu2 %v2022_v26 }
 0x19d   :  { %1092 = vmatpush.bf16.msrb.mxu3 %v2002_v10  ;;  %1105 = vmatpush.bf16.msra.mxu0 %v2006_v11  ;;  %v263_v40 = vsel %vm121_vm1, %v255_v20, %v261_v29 }
 0x1a0   :  { %1025 = vmatpush.bf16.msrb.mxu2 %v2032_v35 }
 0x1a1   :  { %1093 = vmatpush.bf16.msrb.mxu3 %v2013_v19  ;;  %1106 = vmatpush.bf16.msra.mxu0 %v2019_v22 }
 0x1a4   :  { %1026 = vmatpush.bf16.msrb.mxu2 %v2043_v45 }
 0x1a5   :  { %1094 = vmatpush.bf16.msrb.mxu3 %v2025_v30  ;;  %1107 = vmatpush.bf16.msra.mxu0 %v2029_v31 }
 0x1a8   :  { %1027 = vmatpush.bf16.msrb.mxu2 %v2056_v54 }
 0x1a9   :  { %1095 = vmatpush.bf16.msrb.mxu3 %v2036_v39  ;;  %1108 = vmatpush.bf16.msra.mxu0 %v2040_v43 }
 0x1ac   :  { %1028 = vmatpush.bf16.msrb.mxu2 %v2066_v9 }
 0x1ad   :  { %1096 = vmatpush.bf16.msrb.mxu3 %v2049_v50  ;;  %1109 = vmatpush.bf16.msra.mxu0 %v2053_v53 }
 0x1b0   :  { %1029 = vmatpush.bf16.msrb.mxu2 %v2079_v24 }
 0x1b1   :  { %1097 = vmatpush.bf16.msrb.mxu3 %v2059_v62  ;;  %1110 = vmatpush.bf16.msra.mxu0 %v2063_v4 }
 0x1b4   :  { %1030 = vmatpush.bf16.msrb.mxu2 %v2087_v32 }
 0x1b5   :  { %1098 = vmatpush.bf16.msrb.mxu3 %v2072_v21  ;;  %1111 = vmatpush.bf16.msra.mxu0 %v2076_v23 }
 0x215   :  { %v844_v44 = vpop.f32.mrf.mxu0 }
 0x21a   :  { %v818_v47 = vpop.f32.mrf.mxu2  ;;  %v831_v48 = vpop.f32.mrf.mxu3 }
 0x21b   :  { %v848_v51 = vadd.f32 %v818_v47, %v2225_v42  ;;  %v871_v56 = vadd.f32 %v869_v46, %v831_v48  ;;  %v264_v47 = vsel %vm123_vm2, %v263_v40, %v262_v36 }
 0x21c   :  { %267 = vst [vmem:[#allocation2 + $0x12] sm:$0x3f] %v264_v47 }
 0x21d   :  { %v1651_v57 = vmul.f32 -1.442695, %v848_v51  ;;  %v1652_v58 = vmul.f32 -1.442695, %v871_v56  ;;  %v846_v52 = vpop.f32.mrf.mxu0 }
 0x21e   :  { %v893_v52 = vrot.slane %v2225_v42, 4 }
 0x21f   :  { %1761 = vpow2.f32 %v1651_v57  ;;  %v891_v57 = vadd.f32 %v2156_v16, %v844_v44 }
 0x220   :  { %1763 = vpow2.f32 %v1652_v58 }
 0x222   :  { %v820_v49 = vpop.f32.mrf.mxu2  ;;  %v833_v59 = vpop.f32.mrf.mxu3 }
 0x225   :  { %v1762_v60 = vpop.eup %1761 }
 0x226   :  { %v1764_v61 = vpop.eup %1763  ;;  %v852_v34 = vadd.f32 1.0, %v1762_v60 }
 0x227   :  { %v875_v0 = vadd.f32 1.0, %v1764_v61 }
 0x228   :  { %1765 = vrcp.f32 %v852_v34  ;;  %v864_v37 = vand.u32 2147483648, %v852_v34  ;;  %v862_v46 = vand.u32 2147483647, %v852_v34  ;;  %vm858_vm7 = vweird.f32 %v852_v34 }
 0x229   :  { %1767 = vrcp.f32 %v875_v0  ;;  %v887_v61 = vand.u32 2147483648, %v875_v0  ;;  %vm881_vm11 = vweird.f32 %v875_v0  ;;  %v885_v1 = vand.u32 2147483647, %v875_v0 }
 0x22a   :  { %v865_v56 = vor.u32 1.1754944e-38, %v864_v37  ;;  %vm863_vm9 = vcmp.eq.f32.partialorder %v862_v46, 8.507059e+37  ;;  %v287_v46 = vld [vmem:[%s286_s23] ss:$8 sm:$0x7]  ;;  %s410_s23 = sshra.s32 %s1547_s21, 3 }
 0x22b   :  { %vm886_vm13 = vcmp.eq.f32.partialorder %v885_v1, 8.507059e+37  ;;  %s1548_s25 = smul.u32 24, %s410_s23 }
 0x22d   :  { %s416_s29 = sadd.s32 %s1548_s25, %s413_s26 }
 0x22e   :  { %v1766_v14 = vpop.eup %1765  ;;  %s417_s7 = scalar_lea.vmem [#allocation5], %s416_s29 }
 0x22f   :  { %v1768_v15 = vpop.eup %1767  ;;  %v854_v17 = vmul.f32 %v1766_v14, %v852_v34  ;;  %vm859_vm6 = vweird.f32 %v1766_v14  ;;  %v888_v34 = vor.u32 1.1754944e-38, %v887_v61 }
 0x230   :  { %v877_v27 = vmul.f32 %v1768_v15, %v875_v0  ;;  %vm860_vm8 = vmor %vm858_vm7, %vm859_vm6  ;;  %vm882_vm10 = vweird.f32 %v1768_v15 }
 0x231   :  { %v855_v33 = vsub.f32 1.0, %v854_v17  ;;  %vm883_vm12 = vmor %vm881_vm11, %vm882_vm10 }
 0x232   :  { %v878_v38 = vsub.f32 1.0, %v877_v27 }
 0x233   :  { %v856_v41 = vmul.f32 %v1766_v14, %v855_v33 }
 0x234   :  { %v879_v48 = vmul.f32 %v1768_v15, %v878_v38 }
 0x235   :  { %v857_v51 = vadd.f32 %v1766_v14, %v856_v41  ;;  %v277_v41 = vld [vmem:[%s276_s22] ss:$8 sm:$0x7]  ;;  %s1549_s22 = sld [smem:[#allocation4 + $0x87]] }
 0x236   :  { %v880_v59 = vadd.f32 %v1768_v15, %v879_v48  ;;  %v289_v48 = vperm.slane %v277_v41, 0 }
 0x237   :  { %v861_v58 = vsel %vm860_vm8, %v1766_v14, %v857_v51  ;;  %v290_v51 = vperm.slane %v277_v41, 1 }
 0x238   :  { %v866_v49 = vsel %vm863_vm9, %v865_v56, %v861_v58  ;;  %v884_v5 = vsel %vm883_vm12, %v1768_v15, %v880_v59  ;;  %v291_v56 = vperm.slane %v277_v41, 2  ;;  %v297_v58 = vperm.slane %v287_v46, 1 }
 0x239   :  { %v892_v60 = vmul.f32 %v891_v57, %v866_v49  ;;  %v889_v55 = vsel %vm886_vm13, %v888_v34, %v884_v5  ;;  %v296_v57 = vperm.slane %v287_v46, 0 }
 0x23a   :  { %v897_v8 = vsub.f32 1.0, %v889_v55  ;;  %v899_v13 = vmul.f32 %v889_v55, %v2192_v12  ;;  %v2265_v12 = vld [vmem:[#allocation2 + $0x12] sm:$0x3f]  ;;  %v303_v61 = vsel %vm112_vm0, %v290_v51, %v297_v58 }
 0x23b   :  { %v895_v2 = vadd.f32 %v893_v52, %v892_v60  ;;  %v963_v17 = vrot.slane %v2265_v12, 2  ;;  %v298_v52 = vperm.slane %v287_v46, 2  ;;  %v302_v60 = vsel %vm112_vm0, %v289_v48, %v296_v57  ;;  %s420_s24 = sshra.s32 %s1549_s22, 3  ;;  %s423_s28 = sand.u32 7, %s1549_s22 }
 0x23c   :  { %s1550_s27 = smul.u32 24, %s420_s24 }
 0x23d   :  { %1769 = vtanh.f32 %v895_v2  ;;  %v304_v1 = vsel %vm112_vm0, %v291_v56, %v298_v52  ;;  %v308_v2 = vrot.slane %v303_v61, 6 }
 0x23e   :  { %v309_v34 = vrot.slane %v304_v1, 4  ;;  %s426_s30 = sadd.s32 %s1550_s27, %s423_s28 }
 0x23f   :  { %s427_s0 = scalar_lea.vmem [#allocation5], %s426_s30 }
 0x243   :  { %v1770_v44 = vpop.eup %1769 }
 0x244   :  { %v898_v6 = vmul.f32 %v1770_v44, %v897_v8  ;;  %v310_v8 = vsel %vm121_vm1, %v302_v60, %v308_v2 }
 0x246   :  { %v2237_v42 = vadd.f32 %v899_v13, %v898_v6  ;;  %v311_v13 = vsel %vm123_vm2, %v310_v8, %v309_v34 }
 0x247   :  { %314 = vst [vmem:[#allocation2 + $0x18] sm:$0x3f] %v311_v13 }
 0x248   :  { %v902_v63 = vpack.c.bf16 %v2237_v42, %v2237_v42 }
 0x24a   :  { %911 = vmatmul.bf16.vlgmr.msra.gmra.mxu1 %v902_v63  ;;  %924 = vmatmul.bf16.vlgmr.msra.gmra.mxu2 %v902_v63 }
 0x24b   :  { %937 = vmatmul.bf16.vlgmr.msra.gmra.mxu3 %v902_v63  ;;  %1117 = vmatpush.bf16.msra.mxu1 %v2008_v18 }
 0x24c   :  { %1185 = vmatpush.bf16.msra.mxu2 %v1997_v3  ;;  %1198 = vmatpush.bf16.msra.mxu3 %v1999_v7 }
 0x24f   :  { %1118 = vmatpush.bf16.msra.mxu1 %v2022_v26 }
 0x250   :  { %1186 = vmatpush.bf16.msra.mxu2 %v2002_v10  ;;  %1199 = vmatpush.bf16.msra.mxu3 %v2006_v11 }
 0x253   :  { %1119 = vmatpush.bf16.msra.mxu1 %v2032_v35 }
 0x254   :  { %1187 = vmatpush.bf16.msra.mxu2 %v2013_v19  ;;  %1200 = vmatpush.bf16.msra.mxu3 %v2019_v22 }
 0x257   :  { %1120 = vmatpush.bf16.msra.mxu1 %v2043_v45 }
 0x258   :  { %1188 = vmatpush.bf16.msra.mxu2 %v2025_v30  ;;  %1201 = vmatpush.bf16.msra.mxu3 %v2029_v31 }
 0x25b   :  { %1121 = vmatpush.bf16.msra.mxu1 %v2056_v54 }
 0x25c   :  { %1189 = vmatpush.bf16.msra.mxu2 %v2036_v39  ;;  %1202 = vmatpush.bf16.msra.mxu3 %v2040_v43 }
 0x25f   :  { %1122 = vmatpush.bf16.msra.mxu1 %v2066_v9 }
 0x260   :  { %1190 = vmatpush.bf16.msra.mxu2 %v2049_v50  ;;  %1203 = vmatpush.bf16.msra.mxu3 %v2053_v53 }
 0x263   :  { %1123 = vmatpush.bf16.msra.mxu1 %v2079_v24 }
 0x264   :  { %1191 = vmatpush.bf16.msra.mxu2 %v2059_v62  ;;  %1204 = vmatpush.bf16.msra.mxu3 %v2063_v4 }
 0x267   :  { %1124 = vmatpush.bf16.msra.mxu1 %v2087_v32 }
 0x268   :  { %1192 = vmatpush.bf16.msra.mxu2 %v2072_v21  ;;  %1205 = vmatpush.bf16.msra.mxu3 %v2076_v23 }
 0x2c7   :  { %v912_v0 = vpop.f32.mrf.mxu1 }
 0x2c8   :  { %v942_v14 = vadd.f32 %v912_v0, %v2265_v12 }
 0x2ca   :  { %v1653_v15 = vmul.f32 -1.442695, %v942_v14 }
 0x2cc   :  { %1771 = vpow2.f32 %v1653_v15  ;;  %v987_v15 = vrot.slane %v2265_v12, 4 }
 0x2cd   :  { %v925_v20 = vpop.f32.mrf.mxu2 }
 0x2ce   :  { %v965_v25 = vadd.f32 %v963_v17, %v925_v20  ;;  %v938_v27 = vpop.f32.mrf.mxu3 }
 0x2cf   :  { %v914_v28 = vpop.f32.mrf.mxu1 }
 0x2d0   :  { %v1654_v29 = vmul.f32 -1.442695, %v965_v25  ;;  %v985_v28 = vadd.f32 %v2156_v16, %v938_v27 }
 0x2d2   :  { %v1772_v33 = vpop.eup %1771  ;;  %1773 = vpow2.f32 %v1654_v29 }
 0x2d3   :  { %v946_v36 = vadd.f32 1.0, %v1772_v33 }
 0x2d5   :  { %1775 = vrcp.f32 %v946_v36  ;;  %v927_v37 = vpop.f32.mrf.mxu2  ;;  %v958_v55 = vand.u32 2147483648, %v946_v36  ;;  %v956_v6 = vand.u32 2147483647, %v946_v36  ;;  %vm952_vm15 = vweird.f32 %v946_v36 }
 0x2d6   :  { %v940_v38 = vpop.f32.mrf.mxu3 }
 0x2d7   :  { %v959_v17 = vor.u32 1.1754944e-38, %v958_v55  ;;  %vm957_vm4 = vcmp.eq.f32.partialorder %v956_v6, 8.507059e+37 }
 0x2d8   :  { %v1774_v40 = vpop.eup %1773 }
 0x2d9   :  { %v969_v47 = vadd.f32 1.0, %v1774_v40 }
 0x2db   :  { %v1776_v49 = vpop.eup %1775  ;;  %1777 = vrcp.f32 %v969_v47  ;;  %v981_v37 = vand.u32 2147483648, %v969_v47  ;;  %v979_v40 = vand.u32 2147483647, %v969_v47  ;;  %vm975_vm6 = vweird.f32 %v969_v47 }
 0x2dc   :  { %v948_v59 = vmul.f32 %v1776_v49, %v946_v36  ;;  %vm953_vm14 = vweird.f32 %v1776_v49 }
 0x2dd   :  { %vm954_vm3 = vmor %vm952_vm15, %vm953_vm14  ;;  %v982_v36 = vor.u32 1.1754944e-38, %v981_v37  ;;  %vm980_vm8 = vcmp.eq.f32.partialorder %v979_v40, 8.507059e+37 }
 0x2de   :  { %v949_v5 = vsub.f32 1.0, %v948_v59 }
 0x2e0   :  { %v950_v44 = vmul.f32 %v1776_v49, %v949_v5 }
 0x2e1   :  { %v1778_v63 = vpop.eup %1777 }
 0x2e2   :  { %v971_v0 = vmul.f32 %v1778_v63, %v969_v47  ;;  %v951_v14 = vadd.f32 %v1776_v49, %v950_v44  ;;  %vm976_vm5 = vweird.f32 %v1778_v63  ;;  %v334_v47 = vld [vmem:[%s333_s10] ss:$8 sm:$0x7]  ;;  %s1949_s10 = smov [#allocation11]  }
 0x2e3   :  { %vm977_vm7 = vmor %vm975_vm6, %vm976_vm5  ;;  %v343_v61 = vperm.slane %v334_v47, 0  ;;  %v344_v1 = vperm.slane %v334_v47, 1  ;;  %v345_v2 = vperm.slane %v334_v47, 2  ;;  %s1459_s11 = sshll.u32 %s1949_s10, 4  ;;  %s1460_s11 = int_to_ptr.vmem [resolvable:$true] %s1459_s11 }
 0x2e4   :  { %v972_v20 = vsub.f32 1.0, %v971_v0  ;;  %v955_v25 = vsel %vm954_vm3, %v1776_v49, %v951_v14 }
 0x2e5   :  { %v960_v29 = vsel %vm957_vm4, %v959_v17, %v955_v25 }
 0x2e6   :  { %v973_v33 = vmul.f32 %v1778_v63, %v972_v20  ;;  %v986_v38 = vmul.f32 %v985_v28, %v960_v29 }
 0x2e8   :  { %v989_v41 = vadd.f32 %v987_v15, %v986_v38  ;;  %v974_v46 = vadd.f32 %v1778_v63, %v973_v33 }
 0x2ea   :  { %1779 = vtanh.f32 %v989_v41  ;;  %v978_v12 = vsel %vm977_vm7, %v1778_v63, %v974_v46 }
 0x2eb   :  { %v983_v48 = vsel %vm980_vm8, %v982_v36, %v978_v12 }
 0x2ec   :  { %v991_v51 = vsub.f32 1.0, %v983_v48  ;;  %v993_v27 = vmul.f32 %v983_v48, %v2237_v42  ;;  %v324_v42 = vld [vmem:[%s323_s9] ss:$8 sm:$0x7] }
 0x2ed   :  { %v336_v49 = vperm.slane %v324_v42, 0  ;;  %v337_v59 = vperm.slane %v324_v42, 1  ;;  %v338_v60 = vperm.slane %v324_v42, 2 }
 0x2ef   :  { %v349_v8 = vsel %vm112_vm0, %v336_v49, %v343_v61  ;;  %v350_v44 = vsel %vm112_vm0, %v337_v59, %v344_v1  ;;  %v351_v13 = vsel %vm112_vm0, %v338_v60, %v345_v2 }
 0x2f0   :  { %v1780_v56 = vpop.eup %1779  ;;  %v355_v63 = vrot.slane %v350_v44, 6  ;;  %v356_v14 = vrot.slane %v351_v13, 4 }
 0x2f1   :  { %v992_v57 = vmul.f32 %v1780_v56, %v991_v51 }
 0x2f2   :  { %v357_v20 = vsel %vm121_vm1, %v349_v8, %v355_v63 }
 0x2f3   :  { %v2277_v58 = vadd.f32 %v993_v27, %v992_v57  ;;  %v358_v29 = vsel %vm123_vm2, %v357_v20, %v356_v14 }
 0x2f4   :  { %361 = vst [vmem:[#allocation2 + $0x1e] sm:$0x3f] %v358_v29 }
 0x2f5   :  { %v996_v52 = vpack.c.bf16 %v2277_v58, %v2277_v58 }
 0x2f7   :  { %1005 = vmatmul.bf16.vlgmr.msrb.gmra.mxu0 %v996_v52  ;;  %1018 = vmatmul.bf16.vlgmr.msrb.gmra.mxu1 %v996_v52 }
 0x2f8   :  { %1031 = vmatmul.bf16.vlgmr.msrb.gmra.mxu2 %v996_v52  ;;  %1211 = vmatpush.bf16.msrb.mxu0 %v2008_v18 }
 0x2f9   :  { %1279 = vmatpush.bf16.msrb.mxu1 %v1997_v3  ;;  %1292 = vmatpush.bf16.msrb.mxu2 %v1999_v7  ;;  %v2305_v3 = vld [vmem:[#allocation2 + $0x18] sm:$0x3f] }
 0x2fa   :  { %v1057_v7 = vrot.slane %v2305_v3, 2  ;;  %v1081_v40 = vrot.slane %v2305_v3, 4 }
 0x2fc   :  { %1212 = vmatpush.bf16.msrb.mxu0 %v2022_v26 }
 0x2fd   :  { %1280 = vmatpush.bf16.msrb.mxu1 %v2002_v10  ;;  %1293 = vmatpush.bf16.msrb.mxu2 %v2006_v11 }
 0x300   :  { %1213 = vmatpush.bf16.msrb.mxu0 %v2032_v35 }
 0x301   :  { %1281 = vmatpush.bf16.msrb.mxu1 %v2013_v19  ;;  %1294 = vmatpush.bf16.msrb.mxu2 %v2019_v22 }
 0x304   :  { %1214 = vmatpush.bf16.msrb.mxu0 %v2043_v45 }
 0x305   :  { %1282 = vmatpush.bf16.msrb.mxu1 %v2025_v30  ;;  %1295 = vmatpush.bf16.msrb.mxu2 %v2029_v31 }
 0x308   :  { %1215 = vmatpush.bf16.msrb.mxu0 %v2056_v54 }
 0x309   :  { %1283 = vmatpush.bf16.msrb.mxu1 %v2036_v39  ;;  %1296 = vmatpush.bf16.msrb.mxu2 %v2040_v43 }
 0x30c   :  { %1216 = vmatpush.bf16.msrb.mxu0 %v2066_v9 }
 0x30d   :  { %1284 = vmatpush.bf16.msrb.mxu1 %v2049_v50  ;;  %1297 = vmatpush.bf16.msrb.mxu2 %v2053_v53 }
 0x310   :  { %1217 = vmatpush.bf16.msrb.mxu0 %v2079_v24 }
 0x311   :  { %1285 = vmatpush.bf16.msrb.mxu1 %v2059_v62  ;;  %1298 = vmatpush.bf16.msrb.mxu2 %v2063_v4 }
 0x314   :  { %1218 = vmatpush.bf16.msrb.mxu0 %v2087_v32 }
 0x315   :  { %1286 = vmatpush.bf16.msrb.mxu1 %v2072_v21  ;;  %1299 = vmatpush.bf16.msrb.mxu2 %v2076_v23 }
 0x374   :  { %v1006_v10 = vpop.f32.mrf.mxu0  ;;  %v1019_v11 = vpop.f32.mrf.mxu1 }
 0x375   :  { %v1036_v19 = vadd.f32 %v1006_v10, %v2305_v3  ;;  %v1059_v22 = vadd.f32 %v1057_v7, %v1019_v11 }
 0x377   :  { %v1655_v30 = vmul.f32 -1.442695, %v1036_v19  ;;  %v1656_v31 = vmul.f32 -1.442695, %v1059_v22 }
 0x379   :  { %1781 = vpow2.f32 %v1655_v30 }
 0x37a   :  { %1783 = vpow2.f32 %v1656_v31 }
 0x37b   :  { %v1032_v39 = vpop.f32.mrf.mxu2 }
 0x37c   :  { %v1008_v43 = vpop.f32.mrf.mxu0  ;;  %v1021_v50 = vpop.f32.mrf.mxu1  ;;  %v1079_v46 = vadd.f32 %v2156_v16, %v1032_v39 }
 0x37f   :  { %v1782_v53 = vpop.eup %1781 }
 0x380   :  { %v1784_v62 = vpop.eup %1783  ;;  %v1040_v4 = vadd.f32 1.0, %v1782_v53 }
 0x381   :  { %v1063_v21 = vadd.f32 1.0, %v1784_v62 }
 0x382   :  { %1785 = vrcp.f32 %v1040_v4  ;;  %v1052_v17 = vand.u32 2147483648, %v1040_v4  ;;  %v1050_v28 = vand.u32 2147483647, %v1040_v4  ;;  %vm1046_vm10 = vweird.f32 %v1040_v4 }
 0x383   :  { %1787 = vrcp.f32 %v1063_v21  ;;  %v1034_v23 = vpop.f32.mrf.mxu2  ;;  %v1075_v48 = vand.u32 2147483648, %v1063_v21  ;;  %vm1069_vm14 = vweird.f32 %v1063_v21  ;;  %v1073_v56 = vand.u32 2147483647, %v1063_v21 }
 0x384   :  { %v1053_v38 = vor.u32 1.1754944e-38, %v1052_v17  ;;  %vm1051_vm12 = vcmp.eq.f32.partialorder %v1050_v28, 8.507059e+37 }
 0x385   :  { %v1076_v52 = vor.u32 1.1754944e-38, %v1075_v48  ;;  %vm1074_vm3 = vcmp.eq.f32.partialorder %v1073_v56, 8.507059e+37 }
 0x388   :  { %v1786_v5 = vpop.eup %1785 }
 0x389   :  { %v1788_v34 = vpop.eup %1787  ;;  %v1042_v55 = vmul.f32 %v1786_v5, %v1040_v4  ;;  %vm1047_vm9 = vweird.f32 %v1786_v5 }
 0x38a   :  { %v1065_v6 = vmul.f32 %v1788_v34, %v1063_v21  ;;  %vm1048_vm11 = vmor %vm1046_vm10, %vm1047_vm9  ;;  %vm1070_vm13 = vweird.f32 %v1788_v34 }
 0x38b   :  { %v1043_v0 = vsub.f32 1.0, %v1042_v55  ;;  %vm1071_vm15 = vmor %vm1069_vm14, %vm1070_vm13  ;;  %v2332_v55 = vld [vmem:[%s2372_s3] ss:$0 sm:$0xff]  ;;  %s1543_s3 = sld [smem:[#allocation4 + $0x6]] }
 0x38c   :  { %v1066_v15 = vsub.f32 1.0, %v1065_v6 }
 0x38d   :  { %v1044_v25 = vmul.f32 %v1786_v5, %v1043_v0 }
 0x38e   :  { %v1067_v33 = vmul.f32 %v1788_v34, %v1066_v15 }
 0x38f   :  { %v1045_v37 = vadd.f32 %v1786_v5, %v1044_v25 }
 0x390   :  { %v1068_v12 = vadd.f32 %v1788_v34, %v1067_v33 }
 0x391   :  { %v1049_v41 = vsel %vm1048_vm11, %v1786_v5, %v1045_v37  ;;  %s363_s2 = sshra.s32 %s1543_s3, 3  ;;  %s366_s17 = sand.u32 7, %s1543_s3 }
 0x392   :  { %v1054_v36 = vsel %vm1051_vm12, %v1053_v38, %v1049_v41  ;;  %v1072_v27 = vsel %vm1071_vm15, %v1788_v34, %v1068_v12  ;;  %s1544_s15 = smul.u32 24, %s363_s2 }
 0x393   :  { %v1080_v51 = vmul.f32 %v1079_v46, %v1054_v36  ;;  %v1077_v7 = vsel %vm1074_vm3, %v1076_v52, %v1072_v27  ;;  %v381_v46 = vld [vmem:[%s380_s20] ss:$8 sm:$0x7] }
 0x394   :  { %v1085_v10 = vsub.f32 1.0, %v1077_v7  ;;  %v1087_v19 = vmul.f32 %v1077_v7, %v2277_v58  ;;  %v1089_v58 = vld [vmem:[#allocation2 + $0x1e] sm:$0x3f]  ;;  %s369_s1 = sadd.s32 %s1544_s15, %s366_s17  ;;  %v391_v12 = vperm.slane %v381_v46, 1 }
 0x395   :  { %v1083_v57 = vadd.f32 %v1081_v40, %v1080_v51  ;;  %v1151_v30 = vrot.slane %v1089_v58, 2  ;;  %v1175_v34 = vrot.slane %v1089_v58, 4  ;;  %s370_s19 = scalar_lea.vmem [#allocation5], %s369_s1  ;;  %v392_v51 = vperm.slane %v381_v46, 2 }
 0x396   :  { %v371_v41 = vld [vmem:[%s370_s19] ss:$8 sm:$0x7] }
 0x397   :  { %1789 = vtanh.f32 %v1083_v57  ;;  %v384_v36 = vperm.slane %v371_v41, 1  ;;  %v385_v48 = vperm.slane %v371_v41, 2  ;;  %v383_v56 = vperm.slane %v371_v41, 0 }
 0x398   :  { %v390_v57 = vperm.slane %v381_v46, 0 }
 0x399   :  { %v397_v27 = vsel %vm112_vm0, %v384_v36, %v391_v12  ;;  %v398_v52 = vsel %vm112_vm0, %v385_v48, %v392_v51 }
 0x39a   :  { %v402_v7 = vrot.slane %v397_v27, 6 }
 0x39d   :  { %v1790_v3 = vpop.eup %1789 }
 0x39e   :  { %v1086_v11 = vmul.f32 %v1790_v3, %v1085_v10  ;;  %v396_v10 = vsel %vm112_vm0, %v383_v56, %v390_v57  ;;  %v403_v3 = vrot.slane %v398_v52, 4 }
 0x3a0   :  { %v2317_v16 = vadd.f32 %v1087_v19, %v1086_v11  ;;  %v404_v11 = vsel %vm121_vm1, %v396_v10, %v402_v7 }
 0x3a1   :  { %v405_v19 = vsel %vm123_vm2, %v404_v11, %v403_v3 }
 0x3a2   :  { %v1090_v22 = vpack.c.bf16 %v2317_v16, %v2317_v16  ;;  %408 = vst [vmem:[#allocation2 + $0x24] sm:$0x3f] %v405_v19  ;;  %v1726_v19 = vld [vmem:[#allocation10 + $0x38] sm:$0xff] }
 0x3a4   :  { %1099 = vmatmul.bf16.vlgmr.msrb.gmra.mxu3 %v1090_v22  ;;  %1112 = vmatmul.bf16.vlgmr.msra.gmra.mxu0 %v1090_v22 }
 0x3a5   :  { %1125 = vmatmul.bf16.vlgmr.msra.gmra.mxu1 %v1090_v22  ;;  %1305 = vmatpush.bf16.msrb.mxu3 %v2008_v18 }
 0x3a6   :  { %1440 = vmatpush.bf16.msra.mxu0 %v1726_v19 }
 0x3a9   :  { %1306 = vmatpush.bf16.msrb.mxu3 %v2022_v26 }
 0x3ad   :  { %1307 = vmatpush.bf16.msrb.mxu3 %v2032_v35 }
 0x3b1   :  { %1308 = vmatpush.bf16.msrb.mxu3 %v2043_v45 }
 0x3b5   :  { %1309 = vmatpush.bf16.msrb.mxu3 %v2056_v54 }
 0x3b9   :  { %1310 = vmatpush.bf16.msrb.mxu3 %v2066_v9 }
 0x3bd   :  { %1311 = vmatpush.bf16.msrb.mxu3 %v2079_v24 }
 0x3c1   :  { %1312 = vmatpush.bf16.msrb.mxu3 %v2087_v32 }
 0x421   :  { %v1113_v31 = vpop.f32.mrf.mxu0 }
 0x422   :  { %v1153_v39 = vadd.f32 %v1151_v30, %v1113_v31  ;;  %v1126_v43 = vpop.f32.mrf.mxu1 }
 0x423   :  { %v1173_v8 = vadd.f32 %v2332_v55, %v1126_v43 }
 0x424   :  { %v1658_v18 = vmul.f32 -1.442695, %v1153_v39 }
 0x426   :  { %1791 = vpow2.f32 %v1658_v18 }
 0x427   :  { %v1100_v26 = vpop.f32.mrf.mxu3 }
 0x428   :  { %v1130_v50 = vadd.f32 %v1100_v26, %v1089_v58 }
 0x429   :  { %v1115_v35 = vpop.f32.mrf.mxu0 }
 0x42a   :  { %v1657_v53 = vmul.f32 -1.442695, %v1130_v50  ;;  %v1128_v45 = vpop.f32.mrf.mxu1 }
 0x42c   :  { %v1792_v62 = vpop.eup %1791  ;;  %1793 = vpow2.f32 %v1657_v53 }
 0x42d   :  { %v1157_v54 = vadd.f32 1.0, %v1792_v62 }
 0x42f   :  { %v1102_v9 = vpop.f32.mrf.mxu3  ;;  %1795 = vrcp.f32 %v1157_v54  ;;  %v1169_v63 = vand.u32 2147483648, %v1157_v54  ;;  %vm1163_vm9 = vweird.f32 %v1157_v54  ;;  %v1167_v14 = vand.u32 2147483647, %v1157_v54 }
 0x431   :  { %v1170_v20 = vor.u32 1.1754944e-38, %v1169_v63  ;;  %vm1168_vm11 = vcmp.eq.f32.partialorder %v1167_v14, 8.507059e+37 }
 0x432   :  { %v1794_v24 = vpop.eup %1793 }
 0x433   :  { %v1134_v4 = vadd.f32 1.0, %v1794_v24  ;;  %v418_v24 = vld [vmem:[%s417_s7] ss:$8 sm:$0x7] }
 0x435   :  { %1797 = vrcp.f32 %v1134_v4  ;;  %v1796_v32 = vpop.eup %1795  ;;  %v1146_v59 = vand.u32 2147483648, %v1134_v4  ;;  %v1144_v61 = vand.u32 2147483647, %v1134_v4  ;;  %vm1140_vm5 = vweird.f32 %v1134_v4 }
 0x436   :  { %v1159_v21 = vmul.f32 %v1796_v32, %v1157_v54  ;;  %vm1164_vm8 = vweird.f32 %v1796_v32 }
 0x437   :  { %v1147_v5 = vor.u32 1.1754944e-38, %v1146_v59  ;;  %vm1145_vm7 = vcmp.eq.f32.partialorder %v1144_v61, 8.507059e+37  ;;  %vm1165_vm10 = vmor %vm1163_vm9, %vm1164_vm8 }
 0x438   :  { %v1160_v47 = vsub.f32 1.0, %v1159_v21  ;;  %v431_v21 = vperm.slane %v418_v24, 1 }
 0x43a   :  { %v1161_v1 = vmul.f32 %v1796_v32, %v1160_v47 }
 0x43b   :  { %v1798_v23 = vpop.eup %1797 }
 0x43c   :  { %v1136_v42 = vmul.f32 %v1798_v23, %v1134_v4  ;;  %vm1141_vm4 = vweird.f32 %v1798_v23  ;;  %v1162_v13 = vadd.f32 %v1796_v32, %v1161_v1  ;;  %v428_v4 = vld [vmem:[%s427_s0] ss:$8 sm:$0x7] }
 0x43d   :  { %vm1142_vm6 = vmor %vm1140_vm5, %vm1141_vm4  ;;  %v438_v47 = vperm.slane %v428_v4, 1 }
 0x43e   :  { %v1137_v49 = vsub.f32 1.0, %v1136_v42  ;;  %v1166_v17 = vsel %vm1165_vm10, %v1796_v32, %v1162_v13  ;;  %v430_v32 = vperm.slane %v418_v24, 0  ;;  %v437_v42 = vperm.slane %v428_v4, 0 }
 0x43f   :  { %v1171_v25 = vsel %vm1168_vm11, %v1170_v20, %v1166_v17 }
 0x440   :  { %v1138_v60 = vmul.f32 %v1798_v23, %v1137_v49  ;;  %v1179_v28 = vsub.f32 1.0, %v1171_v25  ;;  %v1181_v37 = vmul.f32 %v1171_v25, %v2317_v16  ;;  %v2345_v16 = vld [vmem:[#allocation2 + $0x24] sm:$0x3f]  ;;  %v439_v49 = vperm.slane %v428_v4, 2 }
 0x441   :  { %v1245_v58 = vrot.slane %v2345_v16, 2  ;;  %v443_v1 = vsel %vm112_vm0, %v430_v32, %v437_v42 }
 0x442   :  { %v1139_v2 = vadd.f32 %v1798_v23, %v1138_v60 }
 0x444   :  { %v1143_v44 = vsel %vm1142_vm6, %v1798_v23, %v1139_v2  ;;  %v432_v23 = vperm.slane %v418_v24, 2  ;;  %v444_v2 = vsel %vm112_vm0, %v431_v21, %v438_v47 }
 0x445   :  { %v1148_v6 = vsel %vm1145_vm7, %v1147_v5, %v1143_v44 }
 0x446   :  { %v1174_v0 = vmul.f32 %v1173_v8, %v1148_v6  ;;  %v449_v8 = vrot.slane %v444_v2, 6 }
 0x448   :  { %v1177_v15 = vadd.f32 %v1175_v34, %v1174_v0  ;;  %v445_v34 = vsel %vm112_vm0, %v432_v23, %v439_v49  ;;  %v451_v0 = vsel %vm121_vm1, %v443_v1, %v449_v8 }
 0x449   :  { %v450_v6 = vrot.slane %v445_v34, 4 }
 0x44a   :  { %1799 = vtanh.f32 %v1177_v15 }
 0x44b   :  { %v452_v17 = vsel %vm123_vm2, %v451_v0, %v450_v6 }
 0x44c   :  { %455 = vst [vmem:[#allocation2 + $0x2a] sm:$0x3f] %v452_v17 }
 0x450   :  { %v1800_v29 = vpop.eup %1799 }
 0x451   :  { %v1180_v33 = vmul.f32 %v1800_v29, %v1179_v28 }
 0x453   :  { %v2336_v38 = vadd.f32 %v1181_v37, %v1180_v33  ;;  %v1269_v37 = vrot.slane %v2345_v16, 4 }
 0x455   :  { %v1184_v40 = vpack.c.bf16 %v2336_v38, %v2336_v38 }
 0x457   :  { %1193 = vmatmul.bf16.vlgmr.msra.gmra.mxu2 %v1184_v40  ;;  %1206 = vmatmul.bf16.vlgmr.msra.gmra.mxu3 %v1184_v40 }
 0x458   :  { %1219 = vmatmul.bf16.vlgmr.msrb.gmra.mxu0 %v1184_v40 }
 0x4d5   :  { %v1220_v22 = vpop.f32.mrf.mxu0 }
 0x4d6   :  { %v1267_v29 = vadd.f32 %v2332_v55, %v1220_v22  ;;  %v1724_v22 = vld [vmem:[#allocation10 + $0x28] sm:$0xff] }
 0x4da   :  { %v1194_v30 = vpop.f32.mrf.mxu2  ;;  %v1207_v31 = vpop.f32.mrf.mxu3 }
 0x4db   :  { %v1224_v39 = vadd.f32 %v1194_v30, %v2345_v16  ;;  %v1247_v43 = vadd.f32 %v1245_v58, %v1207_v31  ;;  %v1725_v16 = vld [vmem:[#allocation10 + $0x30] sm:$0xff]  ;;  %v1723_v58 = vld [vmem:[#allocation10 + $0x20] sm:$0xff] }
 0x4dc   :  { %1441 = vmatpush.bf16.msra.mxu0 %v1725_v16  ;;  %v1277_v30 = vld [vmem:[#allocation2 + $0x2a] sm:$0x3f] }
 0x4dd   :  { %v1659_v18 = vmul.f32 -1.442695, %v1224_v39  ;;  %v1660_v26 = vmul.f32 -1.442695, %v1247_v43  ;;  %v1222_v50 = vpop.f32.mrf.mxu0  ;;  %v1722_v39 = vld [vmem:[#allocation10 + $0x18] sm:$0xff]  ;;  %v1363_v8 = vrot.slane %v1277_v30, 4 }
 0x4df   :  { %1801 = vpow2.f32 %v1659_v18  ;;  %v1339_v18 = vrot.slane %v1277_v30, 2 }
 0x4e0   :  { %1803 = vpow2.f32 %v1660_v26  ;;  %1442 = vmatpush.bf16.msra.mxu0 %v1724_v22  ;;  %v1721_v26 = vld [vmem:[#allocation10 + $0x10] sm:$0xff] }
 0x4e2   :  { %v1196_v35 = vpop.f32.mrf.mxu2  ;;  %v1209_v53 = vpop.f32.mrf.mxu3 }
 0x4e3   :  { %v1720_v35 = vld [vmem:[#allocation10 + $0x8] sm:$0xff] }
 0x4e4   :  { %1443 = vmatpush.bf16.msra.mxu0 %v1723_v58 }
 0x4e5   :  { %v1802_v45 = vpop.eup %1801 }
 0x4e6   :  { %v1804_v62 = vpop.eup %1803  ;;  %v1228_v54 = vadd.f32 1.0, %v1802_v45 }
 0x4e7   :  { %v1251_v9 = vadd.f32 1.0, %v1804_v62 }
 0x4e8   :  { %1805 = vrcp.f32 %v1228_v54  ;;  %v1240_v13 = vand.u32 2147483648, %v1228_v54  ;;  %v1238_v15 = vand.u32 2147483647, %v1228_v54  ;;  %vm1234_vm13 = vweird.f32 %v1228_v54  ;;  %1444 = vmatpush.bf16.msra.mxu0 %v1722_v39 }
 0x4e9   :  { %1807 = vrcp.f32 %v1251_v9  ;;  %v1263_v36 = vand.u32 2147483648, %v1251_v9  ;;  %vm1257_vm1 = vweird.f32 %v1251_v9  ;;  %v1261_v12 = vand.u32 2147483647, %v1251_v9 }
 0x4ea   :  { %v1241_v28 = vor.u32 1.1754944e-38, %v1240_v13  ;;  %vm1239_vm0 = vcmp.eq.f32.partialorder %v1238_v15, 8.507059e+37 }
 0x4eb   :  { %v1264_v56 = vor.u32 1.1754944e-38, %v1263_v36  ;;  %vm1262_vm3 = vcmp.eq.f32.partialorder %v1261_v12, 8.507059e+37 }
 0x4ec   :  { %1445 = vmatpush.bf16.msra.mxu0 %v1721_v26 }
 0x4ee   :  { %v1806_v59 = vpop.eup %1805 }
 0x4ef   :  { %v1808_v60 = vpop.eup %1807  ;;  %v1230_v61 = vmul.f32 %v1806_v59, %v1228_v54  ;;  %vm1235_vm12 = vweird.f32 %v1806_v59 }
 0x4f0   :  { %v1253_v5 = vmul.f32 %v1808_v60, %v1251_v9  ;;  %vm1236_vm14 = vmor %vm1234_vm13, %vm1235_vm12  ;;  %vm1258_vm15 = vweird.f32 %v1808_v60  ;;  %1446 = vmatpush.bf16.msra.mxu0 %v1720_v35  ;;  %v1719_v9 = vld [vmem:[#allocation10] sm:$0xff] }
 0x4f1   :  { %v1231_v44 = vsub.f32 1.0, %v1230_v61  ;;  %vm1259_vm2 = vmor %vm1257_vm1, %vm1258_vm15 }
 0x4f2   :  { %v1254_v63 = vsub.f32 1.0, %v1253_v5 }
 0x4f3   :  { %v1232_v14 = vmul.f32 %v1806_v59, %v1231_v44 }
 0x4f4   :  { %v1255_v20 = vmul.f32 %v1808_v60, %v1254_v63  ;;  %1447 = vmatpush.bf16.msra.mxu0 %v1719_v9 }
 0x4f5   :  { %v1233_v25 = vadd.f32 %v1806_v59, %v1232_v14 }
 0x4f6   :  { %v1256_v41 = vadd.f32 %v1808_v60, %v1255_v20 }
 0x4f7   :  { %v1237_v33 = vsel %vm1236_vm14, %v1806_v59, %v1233_v25 }
 0x4f8   :  { %v1242_v40 = vsel %vm1239_vm0, %v1241_v28, %v1237_v33  ;;  %v1260_v51 = vsel %vm1259_vm2, %v1808_v60, %v1256_v41 }
 0x4f9   :  { %v1268_v46 = vmul.f32 %v1267_v29, %v1242_v40  ;;  %v1265_v57 = vsel %vm1262_vm3, %v1264_v56, %v1260_v51 }
 0x4fa   :  { %v1273_v27 = vsub.f32 1.0, %v1265_v57  ;;  %v1275_v10 = vmul.f32 %v1265_v57, %v2336_v38 }
 0x4fb   :  { %v1271_v48 = vadd.f32 %v1269_v37, %v1268_v46 }
 0x4fd   :  { %1809 = vtanh.f32 %v1271_v48  ;;  %v1740_v48 = vld [vmem:[%s2374_s5] ss:$0 sm:$0xff] }
 0x503   :  { %v1810_v52 = vpop.eup %1809 }
 0x504   :  { %v1274_v7 = vmul.f32 %v1810_v52, %v1273_v27 }
 0x506   :  { %v2357_v3 = vadd.f32 %v1275_v10, %v1274_v7 }
 0x508   :  { %v1278_v11 = vpack.c.bf16 %v2357_v3, %v2357_v3 }
 0x50a   :  { %1287 = vmatmul.bf16.vlgmr.msrb.gmra.mxu1 %v1278_v11  ;;  %1300 = vmatmul.bf16.vlgmr.msrb.gmra.mxu2 %v1278_v11 }
 0x50b   :  { %1313 = vmatmul.bf16.vlgmr.msrb.gmra.mxu3 %v1278_v11 }
 0x587   :  { %v1288_v31 = vpop.f32.mrf.mxu1 }
 0x588   :  { %v1318_v38 = vadd.f32 %v1288_v31, %v1277_v30 }
 0x58a   :  { %v1661_v43 = vmul.f32 -1.442695, %v1318_v38 }
 0x58c   :  { %1811 = vpow2.f32 %v1661_v43 }
 0x58d   :  { %v1301_v50 = vpop.f32.mrf.mxu2 }
 0x58e   :  { %v1341_v53 = vadd.f32 %v1339_v18, %v1301_v50  ;;  %v1314_v45 = vpop.f32.mrf.mxu3 }
 0x58f   :  { %v1290_v62 = vpop.f32.mrf.mxu1  ;;  %v1361_v63 = vadd.f32 %v2332_v55, %v1314_v45 }
 0x590   :  { %v1662_v54 = vmul.f32 -1.442695, %v1341_v53 }
 0x592   :  { %v1812_v24 = vpop.eup %1811  ;;  %1813 = vpow2.f32 %v1662_v54 }
 0x593   :  { %v1322_v4 = vadd.f32 1.0, %v1812_v24 }
 0x595   :  { %1815 = vrcp.f32 %v1322_v4  ;;  %v1303_v32 = vpop.f32.mrf.mxu2  ;;  %v1334_v60 = vand.u32 2147483648, %v1322_v4  ;;  %v1332_v1 = vand.u32 2147483647, %v1322_v4  ;;  %vm1328_vm5 = vweird.f32 %v1322_v4 }
 0x596   :  { %v1316_v21 = vpop.f32.mrf.mxu3 }
 0x597   :  { %v1335_v44 = vor.u32 1.1754944e-38, %v1334_v60  ;;  %vm1333_vm7 = vcmp.eq.f32.partialorder %v1332_v1, 8.507059e+37 }
 0x598   :  { %v1814_v23 = vpop.eup %1813 }
 0x599   :  { %v1345_v42 = vadd.f32 1.0, %v1814_v23 }
 0x59b   :  { %v1816_v47 = vpop.eup %1815  ;;  %1817 = vrcp.f32 %v1345_v42  ;;  %v1357_v15 = vand.u32 2147483648, %v1345_v42  ;;  %v1355_v20 = vand.u32 2147483647, %v1345_v42  ;;  %vm1351_vm9 = vweird.f32 %v1345_v42 }
 0x59c   :  { %v1324_v49 = vmul.f32 %v1816_v47, %v1322_v4  ;;  %vm1329_vm4 = vweird.f32 %v1816_v47 }
 0x59d   :  { %vm1330_vm6 = vmor %vm1328_vm5, %vm1329_vm4  ;;  %v1358_v33 = vor.u32 1.1754944e-38, %v1357_v15  ;;  %vm1356_vm11 = vcmp.eq.f32.partialorder %v1355_v20, 8.507059e+37 }
 0x59e   :  { %v1325_v59 = vsub.f32 1.0, %v1324_v49 }
 0x5a0   :  { %v1326_v61 = vmul.f32 %v1816_v47, %v1325_v59 }
 0x5a1   :  { %v1818_v2 = vpop.eup %1817 }
 0x5a2   :  { %v1347_v5 = vmul.f32 %v1818_v2, %v1345_v42  ;;  %v1327_v34 = vadd.f32 %v1816_v47, %v1326_v61  ;;  %vm1352_vm8 = vweird.f32 %v1818_v2 }
 0x5a3   :  { %vm1353_vm10 = vmor %vm1351_vm9, %vm1352_vm8 }
 0x5a4   :  { %v1348_v6 = vsub.f32 1.0, %v1347_v5  ;;  %v1331_v13 = vsel %vm1330_vm6, %v1816_v47, %v1327_v34 }
 0x5a5   :  { %v1336_v0 = vsel %vm1333_vm7, %v1335_v44, %v1331_v13 }
 0x5a6   :  { %v1349_v14 = vmul.f32 %v1818_v2, %v1348_v6  ;;  %v1362_v17 = vmul.f32 %v1361_v63, %v1336_v0 }
 0x5a8   :  { %v1365_v25 = vadd.f32 %v1363_v8, %v1362_v17  ;;  %v1350_v28 = vadd.f32 %v1818_v2, %v1349_v14 }
 0x5aa   :  { %1819 = vtanh.f32 %v1365_v25  ;;  %v1354_v29 = vsel %vm1353_vm10, %v1818_v2, %v1350_v28 }
 0x5ab   :  { %v1359_v37 = vsel %vm1356_vm11, %v1358_v33, %v1354_v29 }
 0x5ac   :  { %v1367_v40 = vsub.f32 1.0, %v1359_v37  ;;  %v1369_v55 = vmul.f32 %v1359_v37, %v2357_v3 }
 0x5b0   :  { %v1820_v41 = vpop.eup %1819 }
 0x5b1   :  { %v1368_v46 = vmul.f32 %v1820_v41, %v1367_v40 }
 0x5b3   :  { %v1370_v36 = vadd.f32 %v1369_v55, %v1368_v46 }
 0x5b5   :  { %v1371_v12 = vpack.c.bf16 %v1370_v36, %v1370_v36 }
 0x5b7   :  { %1448 = vmatmul.bf16.vlgmr.msra.gmra.mxu0 %v1371_v12 }
 0x634   :  { %v1449_v51 = vpop.f32.mrf.mxu0 }
 0x635   :  { %v1450_v56 = vadd.f32 %v1740_v48, %v1449_v51 }
 0x637   :  { %1453 = vst [vmem:[#allocation11] sm:$0x3] %v1450_v56 }
 0x638   :  { %1464 = dma.vmem_to_hbm [thread:$0]  %s1460_s11, 32, %s1462_s13, [#allocation7]  }
 0x63c   :  { %v1451_v57 = vpop.f32.mrf.mxu0 }
 0x63d   :  { %1936 = dma.done.wait [#allocation7], 32  }
 0x63e   :  { %1937 = vsyncadd [#allocation7], 4294967264 }
 0x63f   :  { %1469 = vsyncpa [#allocation6], 1 }
 0x640   :  { %1470 = vsyncpa [#allocation9], 1 }
 0x641   :  { %1471 = vsyncpa [#allocation7], 1 }

</bundles_post_ra>
